<compile_context>
chip_gen: v6e
topology: v6e:2x2x1
jax: 0.10.0
libtpu: 0.0.40
codegen_flags: <defaults>
</compile_context>

<pallas_src>
import functools

import numpy as np
import jax
import jax.numpy as jnp
from jax.experimental import pallas as pl
from jax.experimental.pallas import tpu as pltpu

EMB_DEPTH = 3  # args.emb_depth


def _tsp_graph_kernel(coords_ref, coordst_ref, win_ref, bin_ref, wdelta_ref,
                      wmsg_ref, blyr_ref, expw_ref, ebias_ref,
                      node_out_ref, edge_out_ref):
    Gb, N, _ = coords_ref.shape
    E = win_ref.shape[1]
    NE = N * E

    coords = coords_ref[...]                       # (Gb, N, 2)
    coords_t = coordst_ref[...]                    # (Gb, 2, N)

    cxi = coords[:, :, 0:1]                        # (Gb, N, 1)
    cyi = coords[:, :, 1:2]
    cxj = coords_t[:, 0:1, :]                      # (Gb, 1, N)
    cyj = coords_t[:, 1:2, :]

    # --- pairwise Euclidean distances per graph (diagonal == 0) ---
    dx = cxi - cxj
    dy = cyi - cyj
    dist = jnp.sqrt(dx * dx + dy * dy)             # (Gb, N, N)
    # TODO(synk): mask/eps the diagonal before sqrt if a backward pass is ever
    # added (sqrt(0) is fine forward but has a NaN gradient).

    # --- edge embeddings, compacted IN-KERNEL (no post-kernel gather) ---
    # expw[j, j*E+e] = we[e]  (Linear(1->E) weight folded into the j->(j,e)
    # expansion), so scaled[r, j*E+e] = dist[r, j] * we[e].
    scaled = jnp.dot(dist.reshape(Gb * N, N), expw_ref[...],
                     preferred_element_type=jnp.float32)        # (Gb*N, NE)
    e_full = jnp.maximum(scaled + ebias_ref[...], 0.0).reshape(Gb, N, NE)
    # Drop the diagonal (j == i) E-slot per query row i: two contiguous static
    # slice-stores per row straight into the compact (Gb, N, (N-1)*E) output.
    # Offsets are multiples of E (sub-128 masked stores), but total HBM bytes
    # written are exactly the needed off-diagonal payload.
    for i in range(N):
        if i > 0:
            edge_out_ref[:, i:i + 1, :i * E] = e_full[:, i:i + 1, :i * E]
        if i < N - 1:
            edge_out_ref[:, i:i + 1, i * E:] = e_full[:, i:i + 1, (i + 1) * E:]

    # --- node init: Linear(2->E) + ReLU as two VPU FMAs (no K=2 MXU matmul) ---
    h = jnp.maximum(cxi * win_ref[0:1, :] + cyi * win_ref[1:2, :]
                    + bin_ref[...], 0.0)                        # (Gb, N, E)

    # --- message passing over the complete graph, aggregation folded into the
    #     weights:  agg_i = sum_{j!=i} h_j @ wmsg  =>
    #     h_i <- relu(h_i @ (wself - wmsg) + (sum_j h_j) @ wmsg + b)
    for l in range(EMB_DEPTH):
        s = jnp.sum(h, axis=1)                                  # (Gb, E)
        pooled = jnp.dot(s, wmsg_ref[l],
                         preferred_element_type=jnp.float32)    # (Gb, E)
        hd = jnp.dot(h.reshape(Gb * N, E), wdelta_ref[l],
                     preferred_element_type=jnp.float32).reshape(Gb, N, E)
        h = jnp.maximum(hd + pooled[:, None, :] + blyr_ref[l], 0.0)

    # --- global mean pool per graph ---
    node_out_ref[...] = jnp.mean(h, axis=1, keepdims=True)      # (Gb, 1, E)


@functools.lru_cache(maxsize=None)
def _hw_info():
    """(num_tensorcores_sharing_the_grid, vmem_bytes) with safe fallbacks."""
    num_tc, vmem = 1, 64 * 1024 * 1024          # conservative defaults
    try:
        kind = jax.devices()[0].device_kind.lower()
        if ("v4" in kind) or ("v5p" in kind) or ("7" in kind):
            num_tc = 2                           # megacore / v7x: 2 TCs
        if ("v5" in kind) or ("v6" in kind):
            vmem = 128 * 1024 * 1024
    except Exception:
        pass
    try:
        vmem = int(pltpu.get_tpu_info().vmem_capacity_bytes)
    except Exception:
        pass
    return num_tc, vmem


def _pick_gb(G, N, E):
    """Graphs per grid step: ~512 stacked MXU rows, VMEM-bounded (with 2x
    double-buffering), generation aware (only force extra grid steps on
    chips that shard the grid across 2 TensorCores)."""
    num_tc, vmem = _hw_info()
    nec = (N - 1) * E
    # per-graph bytes: 2x-buffered edge/coords/node blocks + in-flight compute slab
    per_graph = 4 * (2 * (N * nec + 2 * N * 2 + E) + 2 * N * N * E)
    budget = vmem // 2                           # leave half for weights/scratch
    max_gb_vmem = max(1, budget // max(per_graph, 1))
    gb = max(1, min(G, max(1, 512 // N), max_gb_vmem))
    if num_tc > 1 and G > 1:
        # >= 2 steps per TensorCore when G allows (both cores busy + pipelined)
        min_steps = min(2 * num_tc, G)
        gb = max(1, min(gb, -(-G // min_steps)))
    return int(gb)


@functools.partial(jax.jit, static_argnames=("gb",))
def _tsp_encode(coords, win, b_in, wmsg, wself, blyr, we, be, *, gb):
    G, N, nf = coords.shape
    E = win.shape[1]
    NE = N * E
    NEc = (N - 1) * E

    steps = -(-G // gb)
    G_pad = steps * gb
    if G_pad != G:                               # zero-pad awkward G; trim below
        coords = jnp.pad(coords, ((0, G_pad - G), (0, 0), (0, 0)))
    coords_t = jnp.transpose(coords, (0, 2, 1))  # (G_pad, 2, N)

    # Fold the complete-graph aggregation into the self-weights.
    wdelta = wself - wmsg

    # Linear(1->E) edge weight folded into an (N, N*E) expand matrix (kills the
    # in-kernel (N,N,E)->(N,N*E) reshape); edge bias tiled to one (1, N*E) row.
    eye = jnp.eye(N, dtype=jnp.float32)
    expw = (eye[:, :, None] * we[0][None, None, :]).reshape(N, NE)
    ebias_row = jnp.tile(be, (1, N))             # (1, N*E)

    _, vmem = _hw_info()
    vmem_limit = int(min(max(vmem // 2, 32 * 1024 * 1024), 100 * 1024 * 1024))

    flops = (2 * G_pad * N * N * NE                         # edge expand matmul
             + EMB_DEPTH * 2 * G_pad * (N + 1) * E * E      # MP matmuls (folded)
             + 10 * G_pad * N * NE)                         # elementwise / relu
    cost = pl.CostEstimate(
        flops=int(flops),
        transcendentals=int(G_pad * N * N),
        bytes_accessed=int(4 * (4 * G_pad * N * nf + G_pad * E
                                + G_pad * N * NEc)))

    node_emb, edge_cmp = pl.pallas_call(
        _tsp_graph_kernel,
        out_shape=(
            jax.ShapeDtypeStruct((G_pad, 1, E), jnp.float32),
            jax.ShapeDtypeStruct((G_pad, N, NEc), jnp.float32),
        ),
        grid_spec=pltpu.PrefetchScalarGridSpec(
            num_scalar_prefetch=0,
            grid=(steps,),
            in_specs=[
                pl.BlockSpec((gb, N, nf), lambda g: (g, 0, 0)),
                pl.BlockSpec((gb, nf, N), lambda g: (g, 0, 0)),
                pl.BlockSpec((nf, E), lambda g: (0, 0)),
                pl.BlockSpec((1, E), lambda g: (0, 0)),
                pl.BlockSpec((EMB_DEPTH, E, E), lambda g: (0, 0, 0)),
                pl.BlockSpec((EMB_DEPTH, E, E), lambda g: (0, 0, 0)),
                pl.BlockSpec((EMB_DEPTH, 1, E), lambda g: (0, 0, 0)),
                pl.BlockSpec((N, NE), lambda g: (0, 0)),
                pl.BlockSpec((1, NE), lambda g: (0, 0)),
            ],
            out_specs=[
                pl.BlockSpec((gb, 1, E), lambda g: (g, 0, 0)),
                pl.BlockSpec((gb, N, NEc), lambda g: (g, 0, 0)),
            ],
        ),
        compiler_params=pltpu.CompilerParams(
            dimension_semantics=("parallel",),
            vmem_limit_bytes=vmem_limit),
        cost_estimate=cost,
    )(coords, coords_t, win, b_in, wdelta, wmsg, blyr, expw, ebias_row)

    # Trim padding and reshape (row-major == off-diagonal (i, j != i) pair
    # ordering of the complete graph) -- all fused inside this jit.
    node_emb = node_emb[:G].reshape(G, E)
    edge_emb = edge_cmp[:G].reshape(G * N * (N - 1), E)
    return node_emb, edge_emb


class TSPGraphEncoder:
    """JAX/Pallas version of the PyTorch TSPGraphEncoder (no candidate_info)."""

    def __init__(self, num_features, emsize, key):
        self.num_features = num_features
        self.emsize = emsize
        E = emsize
        ks = jax.random.split(key, 4)

        def glorot(k, shape):
            fan_in, fan_out = shape[-2], shape[-1]
            scale = jnp.sqrt(6.0 / (fan_in + fan_out))
            return jax.random.uniform(k, shape, jnp.float32, -scale, scale)

        self.win = glorot(ks[0], (num_features, E))
        self.bin = jnp.zeros((1, E), jnp.float32)
        self.wmsg = glorot(ks[1], (EMB_DEPTH, E, E))
        self.wself = glorot(ks[2], (EMB_DEPTH, E, E))
        self.blyr = jnp.zeros((EMB_DEPTH, 1, E), jnp.float32)
        self.we = glorot(ks[3], (1, E))
        self.be = jnp.zeros((1, E), jnp.float32)

    def forward(self, x, candidate_info=None):
        # x: (seq_len, batch, num_nodes, 2) -- same axis convention as PyTorch.
        seq_len, batch_size, num_nodes, nf = x.shape
        assert nf == self.num_features
        G, N, E = seq_len * batch_size, num_nodes, self.emsize

        coords = x.reshape(G, N, nf).astype(jnp.float32)
        gb = _pick_gb(G, N, E)
        node_emb, edge_emb = _tsp_encode(coords, self.win, self.bin, self.wmsg,
                                         self.wself, self.blyr, self.we,
                                         self.be, gb=gb)

        node_embeddings = node_emb.reshape(seq_len, batch_size, E)

        # ---- host-side bookkeeping (python / numpy, mirrors the PyTorch code) ----
        pairs = np.array([[i, j] for i in range(N) for j in range(N) if i != j],
                         dtype=np.int64).T                      # (2, N*(N-1))
        edge_index = np.concatenate([pairs + g * N for g in range(G)], axis=1)
        edge_index = jnp.asarray(edge_index, dtype=jnp.int32)

        batch_tensor = jnp.asarray(
            np.tile(np.repeat(np.arange(batch_size), N), seq_len),
            dtype=jnp.int32)
        position_tensor = jnp.asarray(
            np.repeat(np.arange(seq_len), batch_size * N), dtype=jnp.int32)

        node_offset_map = {}
        edge_counts = []
        cumulative_nodes = 0
        for pos in range(seq_len):
            for b in range(batch_size):
                for n in range(N):
                    node_offset_map[(pos, b, n)] = cumulative_nodes + n
                cumulative_nodes += N
                edge_counts.append(N * (N - 1))

        return {
            'node_embeddings': node_embeddings,
            'edge_info': (edge_emb, edge_index, batch_tensor, position_tensor,
                          node_offset_map, edge_counts),
        }


def _reference_forward(enc, x):
    """Pure-JAX reference of the same forward math (for correctness check)."""
    seq_len, batch_size, N, nf = x.shape
    G, E = seq_len * batch_size, enc.emsize
    coords = x.reshape(G, N, nf).astype(jnp.float32)
    cx, cy = coords[:, :, 0], coords[:, :, 1]
    dist = jnp.sqrt((cx[:, :, None] - cx[:, None, :]) ** 2 +
                    (cy[:, :, None] - cy[:, None, :]) ** 2)
    adj = 1.0 - jnp.eye(N, dtype=jnp.float32)
    e = jnp.maximum(dist[..., None] * enc.we[0] + enc.be[0], 0.0)
    e = e * adj[None, :, :, None]
    edge_dense = e.reshape(G, N * N, E)
    h = jnp.maximum(jnp.einsum('gnf,fe->gne', coords, enc.win) + enc.bin, 0.0)
    for l in range(EMB_DEPTH):
        m = jnp.einsum('gne,ef->gnf', h, enc.wmsg[l])
        agg = jnp.einsum('ij,gje->gie', adj, m)
        h = jnp.maximum(jnp.einsum('gne,ef->gnf', h, enc.wself[l]) + agg
                        + enc.blyr[l], 0.0)
    node = jnp.mean(h, axis=1).reshape(seq_len, batch_size, E)
    off = np.array([i * N + j for i in range(N) for j in range(N) if i != j],
                   dtype=np.int32)
    edge = edge_dense[:, off, :].reshape(G * N * (N - 1), E)
    return node, edge


if __name__ == "__main__":
    key = jax.random.PRNGKey(0)
    k_x, k_p = jax.random.split(key)

    seq_len, batch, num_nodes, num_features = 4, 2, 8, 2
    emsize = 32

    x = jax.random.uniform(k_x, (seq_len, batch, num_nodes, num_features),
                           dtype=jnp.float32)

    enc = TSPGraphEncoder(num_features, emsize, k_p)
    out = enc.forward(x)

    node = jax.block_until_ready(out['node_embeddings'])
    edge = jax.block_until_ready(out['edge_info'][0])

    assert node.shape == (seq_len, batch, emsize)
    assert edge.shape == (seq_len * batch * num_nodes * (num_nodes - 1), emsize)

    ref_node, ref_edge = _reference_forward(enc, x)
    assert float(jnp.max(jnp.abs(node - ref_node))) < 2e-3
    assert float(jnp.max(jnp.abs(edge - ref_edge))) < 2e-3

    print("KERNEL_OK")
</pallas_src>

<mosaic_0001>
module attributes {stable_mosaic.version = 11 : i64} {
  func.func @_tsp_graph_kernel(%arg0: i32, %arg1: memref<8x8x2xf32, #tpu.memory_space<vmem>>, %arg2: memref<8x2x8xf32, #tpu.memory_space<vmem>>, %arg3: memref<2x32xf32, #tpu.memory_space<vmem>>, %arg4: memref<1x32xf32, #tpu.memory_space<vmem>>, %arg5: memref<3x32x32xf32, #tpu.memory_space<vmem>>, %arg6: memref<3x32x32xf32, #tpu.memory_space<vmem>>, %arg7: memref<3x1x32xf32, #tpu.memory_space<vmem>>, %arg8: memref<8x256xf32, #tpu.memory_space<vmem>>, %arg9: memref<1x256xf32, #tpu.memory_space<vmem>>, %arg10: memref<8x1x32xf32, #tpu.memory_space<vmem>>, %arg11: memref<8x8x224xf32, #tpu.memory_space<vmem>>) attributes {dimension_semantics = [#tpu.dimension_semantics<parallel>], iteration_bounds = array<i64: 1>, scalar_prefetch = 0 : i64, scratch_operands = 0 : i64, tpu.core_type = #tpu.core_type<tc>, window_params = [{transform_indices = @transform_0, window_bounds = array<i64: 8, 8, 2>}, {transform_indices = @transform_1, window_bounds = array<i64: 8, 2, 8>}, {pipeline_mode = #tpu.pipeline_mode<synchronous>, transform_indices = @transform_2, window_bounds = array<i64: 2, 32>}, {pipeline_mode = #tpu.pipeline_mode<synchronous>, transform_indices = @transform_3, window_bounds = array<i64: 1, 32>}, {pipeline_mode = #tpu.pipeline_mode<synchronous>, transform_indices = @transform_4, window_bounds = array<i64: 3, 32, 32>}, {pipeline_mode = #tpu.pipeline_mode<synchronous>, transform_indices = @transform_5, window_bounds = array<i64: 3, 32, 32>}, {pipeline_mode = #tpu.pipeline_mode<synchronous>, transform_indices = @transform_6, window_bounds = array<i64: 3, 1, 32>}, {pipeline_mode = #tpu.pipeline_mode<synchronous>, transform_indices = @transform_7, window_bounds = array<i64: 8, 256>}, {pipeline_mode = #tpu.pipeline_mode<synchronous>, transform_indices = @transform_8, window_bounds = array<i64: 1, 256>}, {transform_indices = @transform_9, window_bounds = array<i64: 8, 1, 32>}, {transform_indices = @transform_10, window_bounds = array<i64: 8, 8, 224>}]} {
    %c0 = arith.constant 0 : index
    %c0_0 = arith.constant 0 : index
    %c0_1 = arith.constant 0 : index
    %0 = vector.load %arg1[%c0, %c0_0, %c0_1] : memref<8x8x2xf32, #tpu.memory_space<vmem>>, vector<8x8x2xf32>
    %c0_2 = arith.constant 0 : index
    %c0_3 = arith.constant 0 : index
    %c0_4 = arith.constant 0 : index
    %1 = vector.load %arg2[%c0_2, %c0_3, %c0_4] : memref<8x2x8xf32, #tpu.memory_space<vmem>>, vector<8x2x8xf32>
    %2 = vector.extract_strided_slice %0 {offsets = [0, 0, 0], sizes = [8, 8, 1], strides = [1, 1, 1]} : vector<8x8x2xf32> to vector<8x8x1xf32>
    %3 = vector.extract_strided_slice %0 {offsets = [0, 0, 1], sizes = [8, 8, 1], strides = [1, 1, 1]} : vector<8x8x2xf32> to vector<8x8x1xf32>
    %4 = vector.extract_strided_slice %1 {offsets = [0, 0, 0], sizes = [8, 1, 8], strides = [1, 1, 1]} : vector<8x2x8xf32> to vector<8x1x8xf32>
    %5 = vector.extract_strided_slice %1 {offsets = [0, 1, 0], sizes = [8, 1, 8], strides = [1, 1, 1]} : vector<8x2x8xf32> to vector<8x1x8xf32>
    %6 = vector.broadcast %2 : vector<8x8x1xf32> to vector<8x8x8xf32>
    %7 = vector.broadcast %4 : vector<8x1x8xf32> to vector<8x8x8xf32>
    %8 = arith.subf %6, %7 : vector<8x8x8xf32>
    %9 = vector.broadcast %3 : vector<8x8x1xf32> to vector<8x8x8xf32>
    %10 = vector.broadcast %5 : vector<8x1x8xf32> to vector<8x8x8xf32>
    %11 = arith.subf %9, %10 : vector<8x8x8xf32>
    %12 = arith.mulf %8, %8 : vector<8x8x8xf32>
    %13 = arith.mulf %11, %11 : vector<8x8x8xf32>
    %14 = arith.addf %12, %13 : vector<8x8x8xf32>
    %15 = math.sqrt %14 : vector<8x8x8xf32>
    %16 = vector.shape_cast %15 : vector<8x8x8xf32> to vector<64x8xf32>
    %c0_5 = arith.constant 0 : index
    %c0_6 = arith.constant 0 : index
    %17 = vector.load %arg8[%c0_5, %c0_6] : memref<8x256xf32, #tpu.memory_space<vmem>>, vector<8x256xf32>
    %cst = arith.constant dense<0.000000e+00> : vector<64x256xf32>
    %18 = tpu.matmul %16, %17, %cst {dimension_numbers = #tpu.dot_dimension_numbers<[1], [0], [0], [1], [0, 0, 1, 1], [], []>} : vector<64x8xf32>, vector<8x256xf32>, vector<64x256xf32> -> vector<64x256xf32>
    %c0_7 = arith.constant 0 : index
    %c0_8 = arith.constant 0 : index
    %19 = vector.load %arg9[%c0_7, %c0_8] : memref<1x256xf32, #tpu.memory_space<vmem>>, vector<1x256xf32>
    %20 = vector.broadcast %19 : vector<1x256xf32> to vector<64x256xf32>
    %21 = arith.addf %18, %20 : vector<64x256xf32>
    %cst_9 = arith.constant 0.000000e+00 : f32
    %22 = vector.broadcast %cst_9 : f32 to vector<64x256xf32>
    %23 = arith.maximumf %21, %22 : vector<64x256xf32>
    %24 = vector.shape_cast %23 : vector<64x256xf32> to vector<8x8x256xf32>
    %25 = vector.extract_strided_slice %24 {offsets = [0, 0, 32], sizes = [8, 1, 224], strides = [1, 1, 1]} : vector<8x8x256xf32> to vector<8x1x224xf32>
    %c0_10 = arith.constant 0 : index
    %c0_11 = arith.constant 0 : index
    %c0_12 = arith.constant 0 : index
    %26 = vector.load %arg11[%c0_10, %c0_11, %c0_12] : memref<8x8x224xf32, #tpu.memory_space<vmem>>, vector<8x1x224xf32>
    tpu.vector_store %arg11[%c0_10, %c0_11, %c0_12], %25 {strides = array<i32>} : memref<8x8x224xf32, #tpu.memory_space<vmem>>, vector<8x1x224xf32>,
    %27 = vector.extract_strided_slice %24 {offsets = [0, 1, 0], sizes = [8, 1, 32], strides = [1, 1, 1]} : vector<8x8x256xf32> to vector<8x1x32xf32>
    %c0_13 = arith.constant 0 : index
    %c1 = arith.constant 1 : index
    %c0_14 = arith.constant 0 : index
    %28 = vector.load %arg11[%c0_13, %c1, %c0_14] : memref<8x8x224xf32, #tpu.memory_space<vmem>>, vector<8x1x32xf32>
    tpu.vector_store %arg11[%c0_13, %c1, %c0_14], %27 {strides = array<i32>} : memref<8x8x224xf32, #tpu.memory_space<vmem>>, vector<8x1x32xf32>,
    %29 = vector.extract_strided_slice %24 {offsets = [0, 1, 64], sizes = [8, 1, 192], strides = [1, 1, 1]} : vector<8x8x256xf32> to vector<8x1x192xf32>
    %c0_15 = arith.constant 0 : index
    %c1_16 = arith.constant 1 : index
    %c32 = arith.constant 32 : index
    %30 = vector.load %arg11[%c0_15, %c1_16, %c32] : memref<8x8x224xf32, #tpu.memory_space<vmem>>, vector<8x1x192xf32>
    tpu.vector_store %arg11[%c0_15, %c1_16, %c32], %29 {strides = array<i32>} : memref<8x8x224xf32, #tpu.memory_space<vmem>>, vector<8x1x192xf32>,
    %31 = vector.extract_strided_slice %24 {offsets = [0, 2, 0], sizes = [8, 1, 64], strides = [1, 1, 1]} : vector<8x8x256xf32> to vector<8x1x64xf32>
    %c0_17 = arith.constant 0 : index
    %c2 = arith.constant 2 : index
    %c0_18 = arith.constant 0 : index
    %32 = vector.load %arg11[%c0_17, %c2, %c0_18] : memref<8x8x224xf32, #tpu.memory_space<vmem>>, vector<8x1x64xf32>
    tpu.vector_store %arg11[%c0_17, %c2, %c0_18], %31 {strides = array<i32>} : memref<8x8x224xf32, #tpu.memory_space<vmem>>, vector<8x1x64xf32>,
    %33 = vector.extract_strided_slice %24 {offsets = [0, 2, 96], sizes = [8, 1, 160], strides = [1, 1, 1]} : vector<8x8x256xf32> to vector<8x1x160xf32>
    %c0_19 = arith.constant 0 : index
    %c2_20 = arith.constant 2 : index
    %c64 = arith.constant 64 : index
    %34 = vector.load %arg11[%c0_19, %c2_20, %c64] : memref<8x8x224xf32, #tpu.memory_space<vmem>>, vector<8x1x160xf32>
    tpu.vector_store %arg11[%c0_19, %c2_20, %c64], %33 {strides = array<i32>} : memref<8x8x224xf32, #tpu.memory_space<vmem>>, vector<8x1x160xf32>,
    %35 = vector.extract_strided_slice %24 {offsets = [0, 3, 0], sizes = [8, 1, 96], strides = [1, 1, 1]} : vector<8x8x256xf32> to vector<8x1x96xf32>
    %c0_21 = arith.constant 0 : index
    %c3 = arith.constant 3 : index
    %c0_22 = arith.constant 0 : index
    %36 = vector.load %arg11[%c0_21, %c3, %c0_22] : memref<8x8x224xf32, #tpu.memory_space<vmem>>, vector<8x1x96xf32>
    tpu.vector_store %arg11[%c0_21, %c3, %c0_22], %35 {strides = array<i32>} : memref<8x8x224xf32, #tpu.memory_space<vmem>>, vector<8x1x96xf32>,
    %37 = vector.extract_strided_slice %24 {offsets = [0, 3, 128], sizes = [8, 1, 128], strides = [1, 1, 1]} : vector<8x8x256xf32> to vector<8x1x128xf32>
    %c0_23 = arith.constant 0 : index
    %c3_24 = arith.constant 3 : index
    %c96 = arith.constant 96 : index
    %38 = vector.load %arg11[%c0_23, %c3_24, %c96] : memref<8x8x224xf32, #tpu.memory_space<vmem>>, vector<8x1x128xf32>
    tpu.vector_store %arg11[%c0_23, %c3_24, %c96], %37 {strides = array<i32>} : memref<8x8x224xf32, #tpu.memory_space<vmem>>, vector<8x1x128xf32>,
    %39 = vector.extract_strided_slice %24 {offsets = [0, 4, 0], sizes = [8, 1, 128], strides = [1, 1, 1]} : vector<8x8x256xf32> to vector<8x1x128xf32>
    %c0_25 = arith.constant 0 : index
    %c4 = arith.constant 4 : index
    %c0_26 = arith.constant 0 : index
    %40 = vector.load %arg11[%c0_25, %c4, %c0_26] : memref<8x8x224xf32, #tpu.memory_space<vmem>>, vector<8x1x128xf32>
    tpu.vector_store %arg11[%c0_25, %c4, %c0_26], %39 {strides = array<i32>} : memref<8x8x224xf32, #tpu.memory_space<vmem>>, vector<8x1x128xf32>,
    %41 = vector.extract_strided_slice %24 {offsets = [0, 4, 160], sizes = [8, 1, 96], strides = [1, 1, 1]} : vector<8x8x256xf32> to vector<8x1x96xf32>
    %c0_27 = arith.constant 0 : index
    %c4_28 = arith.constant 4 : index
    %c128 = arith.constant 128 : index
    %42 = vector.load %arg11[%c0_27, %c4_28, %c128] : memref<8x8x224xf32, #tpu.memory_space<vmem>>, vector<8x1x96xf32>
    tpu.vector_store %arg11[%c0_27, %c4_28, %c128], %41 {strides = array<i32>} : memref<8x8x224xf32, #tpu.memory_space<vmem>>, vector<8x1x96xf32>,
    %43 = vector.extract_strided_slice %24 {offsets = [0, 5, 0], sizes = [8, 1, 160], strides = [1, 1, 1]} : vector<8x8x256xf32> to vector<8x1x160xf32>
    %c0_29 = arith.constant 0 : index
    %c5 = arith.constant 5 : index
    %c0_30 = arith.constant 0 : index
    %44 = vector.load %arg11[%c0_29, %c5, %c0_30] : memref<8x8x224xf32, #tpu.memory_space<vmem>>, vector<8x1x160xf32>
    tpu.vector_store %arg11[%c0_29, %c5, %c0_30], %43 {strides = array<i32>} : memref<8x8x224xf32, #tpu.memory_space<vmem>>, vector<8x1x160xf32>,
    %45 = vector.extract_strided_slice %24 {offsets = [0, 5, 192], sizes = [8, 1, 64], strides = [1, 1, 1]} : vector<8x8x256xf32> to vector<8x1x64xf32>
    %c0_31 = arith.constant 0 : index
    %c5_32 = arith.constant 5 : index
    %c160 = arith.constant 160 : index
    %46 = vector.load %arg11[%c0_31, %c5_32, %c160] : memref<8x8x224xf32, #tpu.memory_space<vmem>>, vector<8x1x64xf32>
    tpu.vector_store %arg11[%c0_31, %c5_32, %c160], %45 {strides = array<i32>} : memref<8x8x224xf32, #tpu.memory_space<vmem>>, vector<8x1x64xf32>,
    %47 = vector.extract_strided_slice %24 {offsets = [0, 6, 0], sizes = [8, 1, 192], strides = [1, 1, 1]} : vector<8x8x256xf32> to vector<8x1x192xf32>
    %c0_33 = arith.constant 0 : index
    %c6 = arith.constant 6 : index
    %c0_34 = arith.constant 0 : index
    %48 = vector.load %arg11[%c0_33, %c6, %c0_34] : memref<8x8x224xf32, #tpu.memory_space<vmem>>, vector<8x1x192xf32>
    tpu.vector_store %arg11[%c0_33, %c6, %c0_34], %47 {strides = array<i32>} : memref<8x8x224xf32, #tpu.memory_space<vmem>>, vector<8x1x192xf32>,
    %49 = vector.extract_strided_slice %24 {offsets = [0, 6, 224], sizes = [8, 1, 32], strides = [1, 1, 1]} : vector<8x8x256xf32> to vector<8x1x32xf32>
    %c0_35 = arith.constant 0 : index
    %c6_36 = arith.constant 6 : index
    %c192 = arith.constant 192 : index
    %50 = vector.load %arg11[%c0_35, %c6_36, %c192] : memref<8x8x224xf32, #tpu.memory_space<vmem>>, vector<8x1x32xf32>
    tpu.vector_store %arg11[%c0_35, %c6_36, %c192], %49 {strides = array<i32>} : memref<8x8x224xf32, #tpu.memory_space<vmem>>, vector<8x1x32xf32>,
    %51 = vector.extract_strided_slice %24 {offsets = [0, 7, 0], sizes = [8, 1, 224], strides = [1, 1, 1]} : vector<8x8x256xf32> to vector<8x1x224xf32>
    %c0_37 = arith.constant 0 : index
    %c7 = arith.constant 7 : index
    %c0_38 = arith.constant 0 : index
    %52 = vector.load %arg11[%c0_37, %c7, %c0_38] : memref<8x8x224xf32, #tpu.memory_space<vmem>>, vector<8x1x224xf32>
    tpu.vector_store %arg11[%c0_37, %c7, %c0_38], %51 {strides = array<i32>} : memref<8x8x224xf32, #tpu.memory_space<vmem>>, vector<8x1x224xf32>,
    %c0_39 = arith.constant 0 : index
    %c0_40 = arith.constant 0 : index
    %53 = vector.load %arg3[%c0_39, %c0_40] : memref<2x32xf32, #tpu.memory_space<vmem>>, vector<1x32xf32>
    %54 = vector.shape_cast %53 : vector<1x32xf32> to vector<1x1x32xf32>
    %55 = vector.broadcast %2 : vector<8x8x1xf32> to vector<8x8x32xf32>
    %56 = vector.broadcast %54 : vector<1x1x32xf32> to vector<8x8x32xf32>
    %57 = arith.mulf %55, %56 : vector<8x8x32xf32>
    %c1_41 = arith.constant 1 : index
    %c0_42 = arith.constant 0 : index
    %58 = vector.load %arg3[%c1_41, %c0_42] : memref<2x32xf32, #tpu.memory_space<vmem>>, vector<1x32xf32>
    %59 = vector.shape_cast %58 : vector<1x32xf32> to vector<1x1x32xf32>
    %60 = vector.broadcast %3 : vector<8x8x1xf32> to vector<8x8x32xf32>
    %61 = vector.broadcast %59 : vector<1x1x32xf32> to vector<8x8x32xf32>
    %62 = arith.mulf %60, %61 : vector<8x8x32xf32>
    %63 = arith.addf %57, %62 : vector<8x8x32xf32>
    %c0_43 = arith.constant 0 : index
    %c0_44 = arith.constant 0 : index
    %64 = vector.load %arg4[%c0_43, %c0_44] : memref<1x32xf32, #tpu.memory_space<vmem>>, vector<1x32xf32>
    %65 = vector.shape_cast %64 : vector<1x32xf32> to vector<1x1x32xf32>
    %66 = vector.broadcast %65 : vector<1x1x32xf32> to vector<8x8x32xf32>
    %67 = arith.addf %63, %66 : vector<8x8x32xf32>
    %cst_45 = arith.constant 0.000000e+00 : f32
    %68 = vector.broadcast %cst_45 : f32 to vector<8x8x32xf32>
    %69 = arith.maximumf %67, %68 : vector<8x8x32xf32>
    %cst_46 = arith.constant dense<0.000000e+00> : vector<8x32xf32>
    %70 = vector.multi_reduction <add>, %69, %cst_46 [1] : vector<8x8x32xf32> to vector<8x32xf32>
    %c0_47 = arith.constant 0 : index
    %c0_48 = arith.constant 0 : index
    %c0_49 = arith.constant 0 : index
    %71 = vector.load %arg6[%c0_47, %c0_48, %c0_49] : memref<3x32x32xf32, #tpu.memory_space<vmem>>, vector<1x32x32xf32>
    %72 = vector.shape_cast %71 : vector<1x32x32xf32> to vector<32x32xf32>
    %cst_50 = arith.constant dense<0.000000e+00> : vector<8x32xf32>
    %73 = tpu.matmul %70, %72, %cst_50 {dimension_numbers = #tpu.dot_dimension_numbers<[1], [0], [0], [1], [0, 0, 1, 1], [], []>} : vector<8x32xf32>, vector<32x32xf32>, vector<8x32xf32> -> vector<8x32xf32>
    %74 = vector.shape_cast %69 : vector<8x8x32xf32> to vector<64x32xf32>
    %c0_51 = arith.constant 0 : index
    %c0_52 = arith.constant 0 : index
    %c0_53 = arith.constant 0 : index
    %75 = vector.load %arg5[%c0_51, %c0_52, %c0_53] : memref<3x32x32xf32, #tpu.memory_space<vmem>>, vector<1x32x32xf32>
    %76 = vector.shape_cast %75 : vector<1x32x32xf32> to vector<32x32xf32>
    %cst_54 = arith.constant dense<0.000000e+00> : vector<64x32xf32>
    %77 = tpu.matmul %74, %76, %cst_54 {dimension_numbers = #tpu.dot_dimension_numbers<[1], [0], [0], [1], [0, 0, 1, 1], [], []>} : vector<64x32xf32>, vector<32x32xf32>, vector<64x32xf32> -> vector<64x32xf32>
    %78 = vector.shape_cast %77 : vector<64x32xf32> to vector<8x8x32xf32>
    %79 = vector.shape_cast %73 : vector<8x32xf32> to vector<8x1x32xf32>
    %80 = vector.broadcast %79 : vector<8x1x32xf32> to vector<8x8x32xf32>
    %81 = arith.addf %78, %80 : vector<8x8x32xf32>
    %c0_55 = arith.constant 0 : index
    %c0_56 = arith.constant 0 : index
    %c0_57 = arith.constant 0 : index
    %82 = vector.load %arg7[%c0_55, %c0_56, %c0_57] : memref<3x1x32xf32, #tpu.memory_space<vmem>>, vector<1x1x32xf32>
    %83 = vector.shape_cast %82 : vector<1x1x32xf32> to vector<1x32xf32>
    %84 = vector.shape_cast %83 : vector<1x32xf32> to vector<1x1x32xf32>
    %85 = vector.broadcast %84 : vector<1x1x32xf32> to vector<8x8x32xf32>
    %86 = arith.addf %81, %85 : vector<8x8x32xf32>
    %cst_58 = arith.constant 0.000000e+00 : f32
    %87 = vector.broadcast %cst_58 : f32 to vector<8x8x32xf32>
    %88 = arith.maximumf %86, %87 : vector<8x8x32xf32>
    %cst_59 = arith.constant dense<0.000000e+00> : vector<8x32xf32>
    %89 = vector.multi_reduction <add>, %88, %cst_59 [1] : vector<8x8x32xf32> to vector<8x32xf32>
    %c1_60 = arith.constant 1 : index
    %c0_61 = arith.constant 0 : index
    %c0_62 = arith.constant 0 : index
    %90 = vector.load %arg6[%c1_60, %c0_61, %c0_62] : memref<3x32x32xf32, #tpu.memory_space<vmem>>, vector<1x32x32xf32>
    %91 = vector.shape_cast %90 : vector<1x32x32xf32> to vector<32x32xf32>
    %cst_63 = arith.constant dense<0.000000e+00> : vector<8x32xf32>
    %92 = tpu.matmul %89, %91, %cst_63 {dimension_numbers = #tpu.dot_dimension_numbers<[1], [0], [0], [1], [0, 0, 1, 1], [], []>} : vector<8x32xf32>, vector<32x32xf32>, vector<8x32xf32> -> vector<8x32xf32>
    %93 = vector.shape_cast %88 : vector<8x8x32xf32> to vector<64x32xf32>
    %c1_64 = arith.constant 1 : index
    %c0_65 = arith.constant 0 : index
    %c0_66 = arith.constant 0 : index
    %94 = vector.load %arg5[%c1_64, %c0_65, %c0_66] : memref<3x32x32xf32, #tpu.memory_space<vmem>>, vector<1x32x32xf32>
    %95 = vector.shape_cast %94 : vector<1x32x32xf32> to vector<32x32xf32>
    %cst_67 = arith.constant dense<0.000000e+00> : vector<64x32xf32>
    %96 = tpu.matmul %93, %95, %cst_67 {dimension_numbers = #tpu.dot_dimension_numbers<[1], [0], [0], [1], [0, 0, 1, 1], [], []>} : vector<64x32xf32>, vector<32x32xf32>, vector<64x32xf32> -> vector<64x32xf32>
    %97 = vector.shape_cast %96 : vector<64x32xf32> to vector<8x8x32xf32>
    %98 = vector.shape_cast %92 : vector<8x32xf32> to vector<8x1x32xf32>
    %99 = vector.broadcast %98 : vector<8x1x32xf32> to vector<8x8x32xf32>
    %100 = arith.addf %97, %99 : vector<8x8x32xf32>
    %c1_68 = arith.constant 1 : index
    %c0_69 = arith.constant 0 : index
    %c0_70 = arith.constant 0 : index
    %101 = vector.load %arg7[%c1_68, %c0_69, %c0_70] : memref<3x1x32xf32, #tpu.memory_space<vmem>>, vector<1x1x32xf32>
    %102 = vector.shape_cast %101 : vector<1x1x32xf32> to vector<1x32xf32>
    %103 = vector.shape_cast %102 : vector<1x32xf32> to vector<1x1x32xf32>
    %104 = vector.broadcast %103 : vector<1x1x32xf32> to vector<8x8x32xf32>
    %105 = arith.addf %100, %104 : vector<8x8x32xf32>
    %cst_71 = arith.constant 0.000000e+00 : f32
    %106 = vector.broadcast %cst_71 : f32 to vector<8x8x32xf32>
    %107 = arith.maximumf %105, %106 : vector<8x8x32xf32>
    %cst_72 = arith.constant dense<0.000000e+00> : vector<8x32xf32>
    %108 = vector.multi_reduction <add>, %107, %cst_72 [1] : vector<8x8x32xf32> to vector<8x32xf32>
    %c2_73 = arith.constant 2 : index
    %c0_74 = arith.constant 0 : index
    %c0_75 = arith.constant 0 : index
    %109 = vector.load %arg6[%c2_73, %c0_74, %c0_75] : memref<3x32x32xf32, #tpu.memory_space<vmem>>, vector<1x32x32xf32>
    %110 = vector.shape_cast %109 : vector<1x32x32xf32> to vector<32x32xf32>
    %cst_76 = arith.constant dense<0.000000e+00> : vector<8x32xf32>
    %111 = tpu.matmul %108, %110, %cst_76 {dimension_numbers = #tpu.dot_dimension_numbers<[1], [0], [0], [1], [0, 0, 1, 1], [], []>} : vector<8x32xf32>, vector<32x32xf32>, vector<8x32xf32> -> vector<8x32xf32>
    %112 = vector.shape_cast %107 : vector<8x8x32xf32> to vector<64x32xf32>
    %c2_77 = arith.constant 2 : index
    %c0_78 = arith.constant 0 : index
    %c0_79 = arith.constant 0 : index
    %113 = vector.load %arg5[%c2_77, %c0_78, %c0_79] : memref<3x32x32xf32, #tpu.memory_space<vmem>>, vector<1x32x32xf32>
    %114 = vector.shape_cast %113 : vector<1x32x32xf32> to vector<32x32xf32>
    %cst_80 = arith.constant dense<0.000000e+00> : vector<64x32xf32>
    %115 = tpu.matmul %112, %114, %cst_80 {dimension_numbers = #tpu.dot_dimension_numbers<[1], [0], [0], [1], [0, 0, 1, 1], [], []>} : vector<64x32xf32>, vector<32x32xf32>, vector<64x32xf32> -> vector<64x32xf32>
    %116 = vector.shape_cast %115 : vector<64x32xf32> to vector<8x8x32xf32>
    %117 = vector.shape_cast %111 : vector<8x32xf32> to vector<8x1x32xf32>
    %118 = vector.broadcast %117 : vector<8x1x32xf32> to vector<8x8x32xf32>
    %119 = arith.addf %116, %118 : vector<8x8x32xf32>
    %c2_81 = arith.constant 2 : index
    %c0_82 = arith.constant 0 : index
    %c0_83 = arith.constant 0 : index
    %120 = vector.load %arg7[%c2_81, %c0_82, %c0_83] : memref<3x1x32xf32, #tpu.memory_space<vmem>>, vector<1x1x32xf32>
    %121 = vector.shape_cast %120 : vector<1x1x32xf32> to vector<1x32xf32>
    %122 = vector.shape_cast %121 : vector<1x32xf32> to vector<1x1x32xf32>
    %123 = vector.broadcast %122 : vector<1x1x32xf32> to vector<8x8x32xf32>
    %124 = arith.addf %119, %123 : vector<8x8x32xf32>
    %cst_84 = arith.constant 0.000000e+00 : f32
    %125 = vector.broadcast %cst_84 : f32 to vector<8x8x32xf32>
    %126 = arith.maximumf %124, %125 : vector<8x8x32xf32>
    %cst_85 = arith.constant dense<0.000000e+00> : vector<8x32xf32>
    %127 = vector.multi_reduction <add>, %126, %cst_85 [1] : vector<8x8x32xf32> to vector<8x32xf32>
    %128 = vector.shape_cast %127 : vector<8x32xf32> to vector<8x1x32xf32>
    %cst_86 = arith.constant 8.000000e+00 : f32
    %129 = vector.broadcast %cst_86 : f32 to vector<8x1x32xf32>
    %130 = arith.divf %128, %129 : vector<8x1x32xf32>
    %c0_87 = arith.constant 0 : index
    %c0_88 = arith.constant 0 : index
    %c0_89 = arith.constant 0 : index
    %131 = vector.load %arg10[%c0_87, %c0_88, %c0_89] : memref<8x1x32xf32, #tpu.memory_space<vmem>>, vector<8x1x32xf32>
    tpu.vector_store %arg10[%c0_87, %c0_88, %c0_89], %130 {strides = array<i32>} : memref<8x1x32xf32, #tpu.memory_space<vmem>>, vector<8x1x32xf32>,
    return
  }
  func.func @transform_0(%arg0: i32) -> (i32, i32, i32) {
    %c0_i32 = arith.constant 0 : i32
    %c0_i32_0 = arith.constant 0 : i32
    %c0_i32_1 = arith.constant 0 : i32
    return %arg0, %c0_i32, %c0_i32_0 : i32, i32, i32
  }
  func.func @transform_1(%arg0: i32) -> (i32, i32, i32) {
    %c0_i32 = arith.constant 0 : i32
    %c0_i32_0 = arith.constant 0 : i32
    %c0_i32_1 = arith.constant 0 : i32
    return %arg0, %c0_i32, %c0_i32_0 : i32, i32, i32
  }
  func.func @transform_2(%arg0: i32) -> (i32, i32) {
    %c0_i32 = arith.constant 0 : i32
    %c0_i32_0 = arith.constant 0 : i32
    %c0_i32_1 = arith.constant 0 : i32
    return %c0_i32, %c0_i32_0 : i32, i32
  }
  func.func @transform_3(%arg0: i32) -> (i32, i32) {
    %c0_i32 = arith.constant 0 : i32
    %c0_i32_0 = arith.constant 0 : i32
    %c0_i32_1 = arith.constant 0 : i32
    return %c0_i32, %c0_i32_0 : i32, i32
  }
  func.func @transform_4(%arg0: i32) -> (i32, i32, i32) {
    %c0_i32 = arith.constant 0 : i32
    %c0_i32_0 = arith.constant 0 : i32
    %c0_i32_1 = arith.constant 0 : i32
    %c0_i32_2 = arith.constant 0 : i32
    return %c0_i32, %c0_i32_0, %c0_i32_1 : i32, i32, i32
  }
  func.func @transform_5(%arg0: i32) -> (i32, i32, i32) {
    %c0_i32 = arith.constant 0 : i32
    %c0_i32_0 = arith.constant 0 : i32
    %c0_i32_1 = arith.constant 0 : i32
    %c0_i32_2 = arith.constant 0 : i32
    return %c0_i32, %c0_i32_0, %c0_i32_1 : i32, i32, i32
  }
  func.func @transform_6(%arg0: i32) -> (i32, i32, i32) {
    %c0_i32 = arith.constant 0 : i32
    %c0_i32_0 = arith.constant 0 : i32
    %c0_i32_1 = arith.constant 0 : i32
    %c0_i32_2 = arith.constant 0 : i32
    return %c0_i32, %c0_i32_0, %c0_i32_1 : i32, i32, i32
  }
  func.func @transform_7(%arg0: i32) -> (i32, i32) {
    %c0_i32 = arith.constant 0 : i32
    %c0_i32_0 = arith.constant 0 : i32
    %c0_i32_1 = arith.constant 0 : i32
    return %c0_i32, %c0_i32_0 : i32, i32
  }
  func.func @transform_8(%arg0: i32) -> (i32, i32) {
    %c0_i32 = arith.constant 0 : i32
    %c0_i32_0 = arith.constant 0 : i32
    %c0_i32_1 = arith.constant 0 : i32
    return %c0_i32, %c0_i32_0 : i32, i32
  }
  func.func @transform_9(%arg0: i32) -> (i32, i32, i32) {
    %c0_i32 = arith.constant 0 : i32
    %c0_i32_0 = arith.constant 0 : i32
    %c0_i32_1 = arith.constant 0 : i32
    return %arg0, %c0_i32, %c0_i32_0 : i32, i32, i32
  }
  func.func @transform_10(%arg0: i32) -> (i32, i32, i32) {
    %c0_i32 = arith.constant 0 : i32
    %c0_i32_0 = arith.constant 0 : i32
    %c0_i32_1 = arith.constant 0 : i32
    return %arg0, %c0_i32, %c0_i32_0 : i32, i32, i32
  }
}

</mosaic_0001>

<bundles_post_ra>
// kernel: sub.1
= control target key start
LH: loop header
LB: loop body
LE: loop exit
PB: predicated region body
PF: predicated region fallthrough
CT: control target
= control target key end

     0   :  { %s276_s0 = inlined_call_operand.vmem [shape: f32[3,32,32], index: 0, kind: input, shape index: {}]   ;;  %s277_s1 = inlined_call_operand.vmem [shape: f32[3,32,32], index: 1, kind: input, shape index: {}]   ;;  %s278_s2 = inlined_call_operand.vmem [shape: f32[3,32,32], index: 2, kind: output, shape index: {}]  }
   0x1   :  { %v3_v0 = vld [vmem:[%s276_s0] sm:$0xff]  ;;  %v126_v9 = vld [vmem:[%s276_s0 + $0x8] sm:$0xff]  ;;  %v135_v18 = vld [vmem:[%s276_s0 + $0x10] sm:$0xff] }
   0x2   :  { %v4_v1 = vld [vmem:[%s277_s1] sm:$0xff]  ;;  %v127_v10 = vld [vmem:[%s277_s1 + $0x8] sm:$0xff]  ;;  %v136_v19 = vld [vmem:[%s277_s1 + $0x10] sm:$0xff] }
   0x3   :  { %v120_v2 = vld [vmem:[%s276_s0 + $0x20] sm:$0xff]  ;;  %v7_v3 = vsub.f32 %v3_v0, %v4_v1  ;;  %v129_v11 = vld [vmem:[%s276_s0 + $0x28] sm:$0xff]  ;;  %v36_v12 = vsub.f32 %v126_v9, %v127_v10  ;;  %v138_v20 = vld [vmem:[%s276_s0 + $0x30] sm:$0xff]  ;;  %v66_v21 = vsub.f32 %v135_v18, %v136_v19 }
   0x4   :  { %v121_v4 = vld [vmem:[%s277_s1 + $0x20] sm:$0xff]  ;;  %v130_v13 = vld [vmem:[%s277_s1 + $0x28] sm:$0xff]  ;;  %v139_v22 = vld [vmem:[%s277_s1 + $0x30] sm:$0xff] }
   0x5   :  { %v123_v5 = vld [vmem:[%s276_s0 + $0x40] sm:$0xff]  ;;  %v16_v7 = vsub.f32 %v120_v2, %v121_v4  ;;  %9 = vst [vmem:[%s278_s2] sm:$0xff] %v7_v3  ;;  %v132_v14 = vld [vmem:[%s276_s0 + $0x48] sm:$0xff]  ;;  %v46_v16 = vsub.f32 %v129_v11, %v130_v13  ;;  %128 = vst [vmem:[%s278_s2 + $0x8] sm:$0xff] %v36_v12  ;;  %v76_v25 = vsub.f32 %v138_v20, %v139_v22 }
   0x6   :  { %v124_v6 = vld [vmem:[%s277_s1 + $0x40] sm:$0xff]  ;;  %v133_v15 = vld [vmem:[%s277_s1 + $0x48] sm:$0xff]  ;;  %v141_v23 = vld [vmem:[%s276_s0 + $0x50] sm:$0xff]  ;;  %137 = vst [vmem:[%s278_s2 + $0x10] sm:$0xff] %v66_v21 }
   0x7   :  { %v26_v8 = vsub.f32 %v123_v5, %v124_v6  ;;  %122 = vst [vmem:[%s278_s2 + $0x20] sm:$0xff] %v16_v7  ;;  %v56_v17 = vsub.f32 %v132_v14, %v133_v15  ;;  %v142_v24 = vld [vmem:[%s277_s1 + $0x50] sm:$0xff]  ;;  %131 = vst [vmem:[%s278_s2 + $0x28] sm:$0xff] %v46_v16  ;;  %v144_v27 = vld [vmem:[%s276_s0 + $0x18] sm:$0xff] }
   0x8   :  { %v86_v26 = vsub.f32 %v141_v23, %v142_v24  ;;  %v145_v28 = vld [vmem:[%s277_s1 + $0x18] sm:$0xff]  ;;  %140 = vst [vmem:[%s278_s2 + $0x30] sm:$0xff] %v76_v25 }
   0x9   :  { %125 = vst [vmem:[%s278_s2 + $0x40] sm:$0xff] %v26_v8  ;;  %134 = vst [vmem:[%s278_s2 + $0x48] sm:$0xff] %v56_v17  ;;  %v147_v29 = vld [vmem:[%s276_s0 + $0x38] sm:$0xff]  ;;  %v96_v30 = vsub.f32 %v144_v27, %v145_v28 }
   0xa   :  { %v148_v31 = vld [vmem:[%s277_s1 + $0x38] sm:$0xff]  ;;  %143 = vst [vmem:[%s278_s2 + $0x50] sm:$0xff] %v86_v26 }
   0xb   :  { %v150_v32 = vld [vmem:[%s276_s0 + $0x58] sm:$0xff]  ;;  %v106_v34 = vsub.f32 %v147_v29, %v148_v31  ;;  %146 = vst [vmem:[%s278_s2 + $0x18] sm:$0xff] %v96_v30 }
   0xc   :  { %v151_v33 = vld [vmem:[%s277_s1 + $0x58] sm:$0xff] }
   0xd   :  { %v116_v35 = vsub.f32 %v150_v32, %v151_v33  ;;  %149 = vst [vmem:[%s278_s2 + $0x38] sm:$0xff] %v106_v34 }
   0xf   :  { %152 = vst [vmem:[%s278_s2 + $0x58] sm:$0xff] %v116_v35 }

// kernel: _tsp_encode.1
= control target key start
LH: loop header
LB: loop body
LE: loop exit
PB: predicated region body
PF: predicated region fallthrough
CT: control target
= control target key end

     0   :  { %v3096_v1 = vmov 1   ;;  %v3097_v2 = vmov 0   ;;  %s4598_s0 = inlined_call_operand.vmem [shape: f32[8,8,2], index: 0, kind: input, shape index: {}]   ;;  %s4599_s1 = inlined_call_operand.vmem [shape: f32[8,2,8], index: 1, kind: input, shape index: {}]   ;;  %s4600_s2 = inlined_call_operand.vmem [shape: f32[2,32], index: 2, kind: input, shape index: {}]   ;;  %s4601_s3 = inlined_call_operand.vmem [shape: f32[1,32], index: 3, kind: input, shape index: {}]   ;;  %s4602_s4 = inlined_call_operand.vmem [shape: f32[3,32,32], index: 4, kind: input, shape index: {}]   ;;  %s4603_s5 = inlined_call_operand.vmem [shape: f32[3,32,32], index: 5, kind: input, shape index: {}]   ;;  %s4604_s6 = inlined_call_operand.vmem [shape: f32[3,1,32], index: 6, kind: input, shape index: {}]   ;;  %s4605_s7 = inlined_call_operand.vmem [shape: f32[8,256], index: 7, kind: input, shape index: {}]   ;;  %s4606_s8 = inlined_call_operand.vmem [shape: f32[1,256], index: 8, kind: input, shape index: {}]   ;;  %s4607_s9 = inlined_call_operand.hbm [shape: f32[8,1,32], index: 9, kind: output, shape index: {0}]   ;;  %s4608_s10 = inlined_call_operand.vmem [shape: f32[8,8,224], index: 10, kind: output, shape index: {1}]  }
   0x1   :  { %v35_v0 = vld [vmem:[%s4598_s0] sm:$0xff]  ;;  %3056 = vset.pattern.permute.xlu1 %v3096_v1  ;;  %3055 = vset.pattern.permute.xlu0 %v3097_v2  ;;  %v36_v3 = vld [vmem:[%s4598_s0 + $0x8] sm:$0xff] }
   0x2   :  { %132 = vperm.xlu1 %3056, %v35_v0   ;;  %53 = vperm.xlu0 %3055, %v35_v0  }
   0x3   :  { %16 = vsyncpa [#allocation3], 0  ;;  %v37_v4 = vld [vmem:[%s4598_s0 + $0x10] sm:$0xff]  ;;  %v38_v5 = vld [vmem:[%s4598_s0 + $0x18] sm:$0xff]  ;;  %v3098_v11 = vmov 0.0   ;;  %vm3099_vm0 = vmmov 0   ;;  %v91_v18 = vlaneseq }
   0x4   :  { %v39_v6 = vld [vmem:[%s4598_s0 + $0x20] sm:$0xff]  ;;  %v40_v7 = vld [vmem:[%s4598_s0 + $0x28] sm:$0xff]  ;;  %v41_v9 = vld [vmem:[%s4598_s0 + $0x30] sm:$0xff]  ;;  %386 = vmatprep.mubr.f32.mxu0 %v3098_v11  ;;  %2953 = vmatprep.subr.mxu1 %v3098_v11  ;;  %vm1486_vm1 = vcmask 261120   ;;  %vm297_vm3 = vcmask 64512   ;;  %vm1555_vm7 = vcmask 1041409  }
   0x5   :  { %v284_v8 = vld [vmem:[%s4605_s7 + $0x8] sm:$0xff]  ;;  %v283_v10 = vld [vmem:[%s4605_s7] sm:$0xff]  ;;  %v42_v12 = vld [vmem:[%s4598_s0 + $0x38] sm:$0xff]  ;;  %2961 = vmatprep.mubr.msk.f32.mxu1 %vm3099_vm0, %v3098_v11  ;;  %v3216_v19 = vshrl.u32 %v91_v18, 7  ;;  %vm1557_vm9 = vcmask 1042434   ;;  %vm1559_vm10 = vcmask 1043459  }
   0x6   :  { %136 = vperm.xlu1 %3056, %v36_v3   ;;  %58 = vperm.xlu0 %3055, %v36_v3   ;;  %v1546_v13 = vld [vmem:[%s4603_s5 + $0x18] sm:$0xff]  ;;  %v1545_v14 = vld [vmem:[%s4603_s5 + $0x10] sm:$0xff]  ;;  %v1544_v15 = vld [vmem:[%s4603_s5 + $0x8] sm:$0xff]  ;;  %vm1561_vm11 = vcmask 1044484   ;;  %s3101_s24 = smov 96  }
   0x7   :  { %352 = vmatprep.subr.mxu0 %v284_v8  ;;  %2954 = vmatpush3.msra.mxu1 %v1546_v13  ;;  %v1543_v16 = vld [vmem:[%s4603_s5] sm:$0xff]  ;;  %v3210_v17 = vld [vmem:[%s4602_s4 + $0x18] sm:$0xff]  ;;  %v3219_v20 = vsub.s32 0, %v3216_v19  ;;  %v3222_v21 = vsub.s32 1, %v3216_v19  ;;  %v47_v59 = vld [vmem:[%s4599_s1 + $0x8] sm:$0x3] }
   0x8   :  { %353 = vmatpush1.msra.mxu0 %v283_v10  ;;  %2955 = vmatprep.subr.mxu1 %v3098_v11  ;;  %v43_v22 = vld [vmem:[%s4599_s1] sm:$0x3]  ;;  %v44_v27 = vld [vmem:[%s4599_s1 + $0x2] sm:$0x3]  ;;  %v45_v33 = vld [vmem:[%s4599_s1 + $0x4] sm:$0x3] }
   0x9   :  { %2956 = vmatpush3.msra.mxu1 %v1545_v14  ;;  %v166_v23 = vrot.slane %v43_v22, %v3222_v21  ;;  %v3231_v24 = vld [vmem:[%s4600_s2 + $0x1] ss:$0 sm:$0xff]  ;;  %v94_v25 = vrot.slane %v43_v22, %v3219_v20  ;;  %v3237_v26 = vld [vmem:[%s4600_s2] ss:$0 sm:$0xff]  ;;  %v170_v32 = vrot.slane %v44_v27, %v3222_v21  ;;  %v98_v37 = vrot.slane %v44_v27, %v3219_v20  ;;  %v46_v42 = vld [vmem:[%s4599_s1 + $0x6] sm:$0x3] }
   0xa   :  { %140 = vperm.xlu1 %3056, %v37_v4   ;;  %63 = vperm.xlu0 %3055, %v37_v4   ;;  %v3251_v35 = vld [vmem:[%s4601_s3] ss:$0 sm:$0xff]  ;;  %v174_v41 = vrot.slane %v45_v33, %v3222_v21  ;;  %v102_v46 = vrot.slane %v45_v33, %v3219_v20  ;;  %v178_v52 = vrot.slane %v46_v42, %v3222_v21  ;;  %v48_v0 = vld [vmem:[%s4599_s1 + $0xa] sm:$0x3] }
   0xb   :  { %2957 = vmatprep.subr.mxu1 %v3098_v11  ;;  %v106_v58 = vrot.slane %v46_v42, %v3219_v20  ;;  %v110_v8 = vrot.slane %v47_v59, %v3219_v20  ;;  %v114_v33 = vrot.slane %v48_v0, %v3219_v20 }
   0xc   :  { %2958 = vmatpush3.msra.mxu1 %v1544_v15  ;;  %v186_v15 = vrot.slane %v48_v0, %v3222_v21 }
   0xd   :  { %2959 = vmatprep.subr.mxu1 %v3098_v11 }
   0xe   :  { %144 = vperm.xlu1 %3056, %v38_v5   ;;  %68 = vperm.xlu0 %3055, %v38_v5  }
   0xf   :  { %2960 = vmatpush3.msra.mxu1 %v1543_v16  ;;  %v3292_v16 = vld [vmem:[%s4599_s1 + $0xc] sm:$0x3] }
  0x10   :  { %2964 = vmatprep.subr.mxu1 %v3210_v17 }
  0x12   :  { %148 = vperm.xlu1 %3056, %v39_v6   ;;  %73 = vperm.xlu0 %3055, %v39_v6  }
  0x16   :  { %152 = vperm.xlu1 %3056, %v40_v7   ;;  %78 = vperm.xlu0 %3055, %v40_v7   ;;  %v182_v7 = vrot.slane %v47_v59, %v3222_v21 }
  0x1a   :  { %156 = vperm.xlu1 %3056, %v41_v9   ;;  %83 = vperm.xlu0 %3055, %v41_v9  }
  0x1e   :  { %160 = vperm.xlu1 %3056, %v42_v12   ;;  %88 = vperm.xlu0 %3055, %v42_v12  }
  0x22   :  { %3057 = vset.pattern.permute.xlu0 %v3096_v1 }
  0x7d   :  { %v133_v28 = vpop.permute.xlu1 %132  ;;  %v54_v29 = vpop.permute.xlu0 %53 }
  0x7e   :  { %v1447_v30 = vmul.f32 %v3231_v24, %v133_v28  ;;  %v1434_v31 = vmul.f32 %v3237_v26, %v54_v29  ;;  %v195_v34 = vsub.f32 %v133_v28, %v166_v23  ;;  %v123_v36 = vsub.f32 %v54_v29, %v94_v25 }
  0x80   :  { %v1455_v38 = vadd.f32 %v1447_v30, %v1434_v31  ;;  %v211_v47 = vmul.f32 %v195_v34, %v195_v34  ;;  %v203_v48 = vmul.f32 %v123_v36, %v123_v36  ;;  %v190_v34 = vrot.slane %v3292_v16, %v3222_v21 }
  0x81   :  { %v137_v39 = vpop.permute.xlu1 %136  ;;  %v59_v40 = vpop.permute.xlu0 %58 }
  0x82   :  { %v3259_v43 = vadd.f32 %v3251_v35, %v1455_v38  ;;  %v196_v44 = vsub.f32 %v137_v39, %v170_v32  ;;  %v1448_v45 = vmul.f32 %v3231_v24, %v137_v39  ;;  %v124_v49 = vsub.f32 %v59_v40, %v98_v37 }
  0x83   :  { %v1435_v50 = vmul.f32 %v3237_v26, %v59_v40  ;;  %v3277_v1 = vadd.f32 %v211_v47, %v203_v48  ;;  %v118_v40 = vrot.slane %v3292_v16, %v3219_v20 }
  0x84   :  { %v1478_v51 = vmax.f32 %v3259_v43, 0.0  ;;  %v212_v53 = vmul.f32 %v196_v44, %v196_v44  ;;  %v204_v54 = vmul.f32 %v124_v49, %v124_v49  ;;  %v2872_v43 = vld [vmem:[%s4602_s4 + $0x38] sm:$0xff] }
  0x85   :  { %v1456_v55 = vadd.f32 %v1448_v45, %v1435_v50  ;;  %v141_v56 = vpop.permute.xlu1 %140  ;;  %v64_v57 = vpop.permute.xlu0 %63  ;;  %3058 = vrsqrt.f32 %v3277_v1  ;;  %vm229_vm2 = vcmp.eq.f32.partialorder %v3277_v1, inf  ;;  %vm231_vm4 = vcmp.eq.f32.partialorder %v3277_v1, 0.0  ;;  %2995 = vmatprep.subr.mxu0 %v2872_v43 }
  0x86   :  { %v1487_v60 = vsel %vm1486_vm1, %v1478_v51, 0.0  ;;  %v197_v61 = vsub.f32 %v141_v56, %v174_v41  ;;  %v1449_v62 = vmul.f32 %v3231_v24, %v141_v56  ;;  %v125_v63 = vsub.f32 %v64_v57, %v102_v46  ;;  %v3315_v41 = vld [vmem:[%s4599_s1 + $0xe] sm:$0x3] }
  0x87   :  { %v1488_v2 = vrot.slane %v1487_v60, 4  ;;  %v3280_v3 = vadd.f32 %v3251_v35, %v1456_v55  ;;  %v1436_v4 = vmul.f32 %v3237_v26, %v64_v57  ;;  %v3285_v9 = vadd.f32 %v212_v53, %v204_v54 }
  0x88   :  { %v213_v5 = vmul.f32 %v197_v61, %v197_v61  ;;  %v205_v6 = vmul.f32 %v125_v63, %v125_v63  ;;  %v194_v53 = vrot.slane %v3315_v41, %v3222_v21  ;;  %v122_v54 = vrot.slane %v3315_v41, %v3219_v20 }
  0x89   :  { %v1479_v10 = vmax.f32 %v3280_v3, 0.0  ;;  %v1457_v12 = vadd.f32 %v1449_v62, %v1436_v4  ;;  %v145_v13 = vpop.permute.xlu1 %144  ;;  %v69_v14 = vpop.permute.xlu0 %68  ;;  %v1489_v22 = vadd.f32 %v1488_v2, %v1487_v60  ;;  %3060 = vrsqrt.f32 %v3285_v9  ;;  %v2870_v3 = vld [vmem:[%s4602_s4 + $0x28] sm:$0xff] }
  0x8a   :  { %v198_v23 = vsub.f32 %v145_v13, %v178_v52  ;;  %v1450_v25 = vmul.f32 %v3231_v24, %v145_v13  ;;  %v126_v27 = vsub.f32 %v69_v14, %v106_v58  ;;  %v1437_v30 = vmul.f32 %v3237_v26, %v69_v14 }
  0x8b   :  { %v1494_v28 = vsel %vm1486_vm1, %v1479_v10, 0.0  ;;  %v3300_v29 = vadd.f32 %v3251_v35, %v1457_v12  ;;  %v3303_v32 = vadd.f32 %v213_v5, %v205_v6  ;;  %v1490_v42 = vrot.slane %v1489_v22, 2 }
  0x8c   :  { %v1495_v31 = vrot.slane %v1494_v28, 4  ;;  %v1458_v37 = vadd.f32 %v1450_v25, %v1437_v30  ;;  %v214_v44 = vmul.f32 %v198_v23, %v198_v23  ;;  %v206_v45 = vmul.f32 %v126_v27, %v126_v27 }
  0x8d   :  { %v1480_v36 = vmax.f32 %v3300_v29, 0.0  ;;  %v149_v38 = vpop.permute.xlu1 %148  ;;  %v74_v39 = vpop.permute.xlu0 %73  ;;  %3062 = vrsqrt.f32 %v3303_v32  ;;  %v3331_v61 = vadd.f32 %v1490_v42, %v1489_v22  ;;  %v232_v13 = vand.u32 2147483648, %v3277_v1  ;;  %v2867_v29 = vld [vmem:[%s4603_s5 + $0x38] sm:$0xff] }
  0x8e   :  { %v199_v46 = vsub.f32 %v149_v38, %v182_v7  ;;  %v3321_v48 = vadd.f32 %v3251_v35, %v1458_v37  ;;  %v1451_v49 = vmul.f32 %v3231_v24, %v149_v38  ;;  %v127_v50 = vsub.f32 %v74_v39, %v110_v8 }
  0x8f   :  { %v1501_v47 = vsel %vm1486_vm1, %v1480_v36, 0.0  ;;  %v1496_v52 = vadd.f32 %v1495_v31, %v1494_v28  ;;  %v1438_v58 = vmul.f32 %v3237_v26, %v74_v39  ;;  %v3333_v63 = vadd.f32 %v214_v44, %v206_v45 }
  0x90   :  { %v1481_v55 = vmax.f32 %v3321_v48, 0.0  ;;  %v215_v56 = vmul.f32 %v199_v46, %v199_v46  ;;  %v207_v57 = vmul.f32 %v127_v50, %v127_v50  ;;  %v1502_v62 = vrot.slane %v1501_v47, 4  ;;  %v2865_v48 = vld [vmem:[%s4603_s5 + $0x28] sm:$0xff] }
  0x91   :  { %v153_v59 = vpop.permute.xlu1 %152  ;;  %v79_v60 = vpop.permute.xlu0 %78  ;;  %v1459_v4 = vadd.f32 %v1451_v49, %v1438_v58  ;;  %v1497_v7 = vrot.slane %v1496_v52, 2  ;;  %v1492_v27 = vrot.slane %v3331_v61, 1  ;;  %3064 = vrsqrt.f32 %v3333_v63 }
  0x92   :  { %v200_v0 = vsub.f32 %v153_v59, %v186_v15  ;;  %v1508_v2 = vsel %vm1486_vm1, %v1481_v55, 0.0  ;;  %v1452_v5 = vmul.f32 %v3231_v24, %v153_v59  ;;  %v128_v6 = vsub.f32 %v79_v60, %v114_v33  ;;  %v3059_v39 = vpop.eup %3058 }
  0x93   :  { %v1509_v8 = vrot.slane %v1508_v2, 4  ;;  %v3341_v14 = vadd.f32 %v215_v56, %v207_v57  ;;  %v3344_v16 = vadd.f32 %v3251_v35, %v1459_v4  ;;  %v1439_v22 = vmul.f32 %v3237_v26, %v79_v60 }
  0x94   :  { %v216_v12 = vmul.f32 %v200_v0, %v200_v0  ;;  %v208_v15 = vmul.f32 %v128_v6, %v128_v6  ;;  %v1503_v28 = vadd.f32 %v1502_v62, %v1501_v47  ;;  %v1498_v42 = vadd.f32 %v1497_v7, %v1496_v52 }
  0x95   :  { %v157_v23 = vpop.permute.xlu1 %156  ;;  %v84_v25 = vpop.permute.xlu0 %83  ;;  %v1482_v31 = vmax.f32 %v3344_v16, 0.0  ;;  %v1460_v37 = vadd.f32 %v1452_v5, %v1439_v22  ;;  %v1510_v44 = vadd.f32 %v1509_v8, %v1508_v2  ;;  %3066 = vrsqrt.f32 %v3341_v14  ;;  %v285_v16 = vld [vmem:[%s4606_s8] sm:$0x3] }
  0x96   :  { %v201_v30 = vsub.f32 %v157_v23, %v190_v34  ;;  %v3351_v33 = vadd.f32 %v216_v12, %v208_v15  ;;  %v1453_v38 = vmul.f32 %v3231_v24, %v157_v23  ;;  %v129_v46 = vsub.f32 %v84_v25, %v118_v40  ;;  %v3061_v56 = vpop.eup %3060 }
  0x97   :  { %v1515_v34 = vsel %vm1486_vm1, %v1482_v31, 0.0  ;;  %v3359_v47 = vadd.f32 %v3251_v35, %v1460_v37  ;;  %v1440_v49 = vmul.f32 %v3237_v26, %v84_v25  ;;  %vm236_vm5 = vcmp.eq.f32.partialorder %v3285_v9, inf }
  0x98   :  { %v217_v45 = vmul.f32 %v201_v30, %v201_v30  ;;  %v1504_v57 = vrot.slane %v1503_v28, 2  ;;  %v1516_v52 = vrot.slane %v1515_v34, 4  ;;  %3068 = vrsqrt.f32 %v3351_v33 }
  0x99   :  { %v161_v50 = vpop.permute.xlu1 %160  ;;  %v209_v40 = vmul.f32 %v129_v46, %v129_v46  ;;  %v1483_v58 = vmax.f32 %v3359_v47, 0.0  ;;  %v1461_v59 = vadd.f32 %v1453_v38, %v1440_v49  ;;  %v228_v60 = vmul.f32 %v3059_v39, %v3277_v1  ;;  %v89_v6 = vpop.permute.xlu0 %88 }
  0x9a   :  { %v202_v62 = vsub.f32 %v161_v50, %v194_v53  ;;  %v1499_v0 = vrot.slane %v1498_v42, 1  ;;  %v1511_v2 = vrot.slane %v1510_v44, 2  ;;  %v1517_v4 = vadd.f32 %v1516_v52, %v1515_v34  ;;  %v3063_v7 = vpop.eup %3062 }
  0x9b   :  { %v3366_v5 = vadd.f32 %v217_v45, %v209_v40  ;;  %v1522_v8 = vsel %vm1486_vm1, %v1483_v58, 0.0  ;;  %v3372_v12 = vadd.f32 %v3251_v35, %v1461_v59  ;;  %v230_v15 = vsel %vm229_vm2, %v3277_v1, %v228_v60 }
  0x9c   :  { %v1454_v53 = vmul.f32 %v3231_v24, %v161_v50  ;;  %v3378_v22 = vadd.f32 %v1504_v57, %v1503_v28  ;;  %v1523_v23 = vrot.slane %v1522_v8, 4  ;;  %v218_v25 = vmul.f32 %v202_v62, %v202_v62 }
  0x9d   :  { %3070 = vrsqrt.f32 %v3366_v5  ;;  %v1484_v30 = vmax.f32 %v3372_v12, 0.0  ;;  %v233_v37 = vsel %vm231_vm4, %v232_v13, %v230_v15  ;;  %v130_v38 = vsub.f32 %v89_v6, %v122_v54 }
  0x9e   :  { %v1441_v39 = vmul.f32 %v3237_v26, %v89_v6  ;;  %v3388_v45 = vadd.f32 %v1511_v2, %v1510_v44  ;;  %v1518_v24 = vrot.slane %v1517_v4, 2  ;;  %v1524_v28 = vadd.f32 %v1523_v23, %v1522_v8  ;;  %2796 = vmatmul.mubr.msk.f32.vlgmr.msra.gmra.mxu0 %vm297_vm3, %v233_v37  ;;  %v3065_v49 = vpop.eup %3064 }
  0x9f   :  { %v235_v46 = vmul.f32 %v3061_v56, %v3285_v9  ;;  %v1529_v34 = vsel %vm1486_vm1, %v1484_v30, 0.0  ;;  %392 = vmatprep.mubr.f32.mxu0 %v3098_v11  ;;  %v210_v1 = vmul.f32 %v130_v38, %v130_v38  ;;  %v239_v41 = vand.u32 2147483648, %v3285_v9  ;;  %2996 = vmatpush3.msra.mxu0 %v2872_v43 }
  0xa0   :  { %v1462_v13 = vadd.f32 %v1454_v53, %v1441_v39  ;;  %v1525_v54 = vrot.slane %v1524_v28, 2  ;;  %v1530_v26 = vrot.slane %v1529_v34, 4  ;;  %vm238_vm6 = vcmp.eq.f32.partialorder %v3285_v9, 0.0 }
  0xa1   :  { %v237_v44 = vsel %vm236_vm5, %v3285_v9, %v235_v46  ;;  %v3401_v50 = vadd.f32 %v218_v25, %v210_v1  ;;  %v242_v52 = vmul.f32 %v3063_v7, %v3303_v32  ;;  %v1500_v40 = vadd.f32 %v1499_v0, %v1498_v42 }
  0xa2   :  { %v3404_v56 = vadd.f32 %v3251_v35, %v1462_v13  ;;  %v240_v57 = vsel %vm238_vm6, %v239_v41, %v237_v44  ;;  %v1519_v59 = vadd.f32 %v1518_v24, %v1517_v4  ;;  %v1531_v60 = vadd.f32 %v1530_v26, %v1529_v34  ;;  %v3067_v2 = vpop.eup %3066 }
  0xa3   :  { %2797 = vmatmul.mubr.msk.f32.gmra.mxu0 %vm297_vm3, %v240_v57  ;;  %vm243_vm8 = vcmp.eq.f32.partialorder %v3303_v32, inf  ;;  %v1526_v62 = vadd.f32 %v1525_v54, %v1524_v28  ;;  %3072 = vrsqrt.f32 %v3401_v50  ;;  %v1506_v42 = vrot.slane %v3378_v22, 1 }
  0xa4   :  { %v1485_v9 = vmax.f32 %v3404_v56, 0.0  ;;  %398 = vmatprep.mubr.f32.mxu0 %v3098_v11  ;;  %v244_v35 = vsel %vm243_vm8, %v3303_v32, %v242_v52  ;;  %v1532_v0 = vrot.slane %v1531_v60, 2  ;;  %v246_v4 = vand.u32 2147483648, %v3303_v32 }
  0xa5   :  { %v249_v6 = vmul.f32 %v3065_v49, %v3333_v63  ;;  %v3069_v7 = vpop.eup %3068  ;;  %v1513_v8 = vrot.slane %v3388_v45, 1  ;;  %vm245_vm12 = vcmp.eq.f32.partialorder %v3303_v32, 0.0  ;;  %vm250_vm13 = vcmp.eq.f32.partialorder %v3333_v63, inf }
  0xa6   :  { %v1536_v15 = vsel %vm1486_vm1, %v1485_v9, 0.0  ;;  %v247_v23 = vsel %vm245_vm12, %v246_v4, %v244_v35  ;;  %v253_v37 = vand.u32 2147483648, %v3333_v63  ;;  %v1520_v38 = vrot.slane %v1519_v59, 1 }
  0xa7   :  { %v1537_v53 = vrot.slane %v1536_v15, 4  ;;  %v251_v25 = vsel %vm250_vm13, %v3333_v63, %v249_v6  ;;  %v1527_v39 = vrot.slane %v1526_v62, 1  ;;  %2798 = vmatmul.mubr.msk.f32.gmra.mxu0 %vm297_vm3, %v247_v23  ;;  %vm252_vm14 = vcmp.eq.f32.partialorder %v3333_v63, 0.0  ;;  %v1643_v23 = vld [vmem:[%s4602_s4 + $0x10] sm:$0xff] }
  0xa8   :  { %v256_v24 = vmul.f32 %v3067_v2, %v3341_v14  ;;  %v1533_v28 = vadd.f32 %v1532_v0, %v1531_v60  ;;  %404 = vmatprep.mubr.f32.mxu0 %v3098_v11  ;;  %v254_v32 = vsel %vm252_vm14, %v253_v37, %v251_v25  ;;  %vm257_vm15 = vcmp.eq.f32.partialorder %v3341_v14, inf  ;;  %v1642_v37 = vld [vmem:[%s4602_s4 + $0x8] sm:$0xff] }
  0xa9   :  { %v1538_v46 = vadd.f32 %v1537_v53, %v1536_v15  ;;  %v1507_v1 = vadd.f32 %v1506_v42, %v3378_v22  ;;  %v260_v41 = vand.u32 2147483648, %v3341_v14  ;;  %v263_v54 = vmul.f32 %v3069_v7, %v3351_v33 }
  0xaa   :  { %v3071_v34 = vpop.eup %3070  ;;  %v258_v13 = vsel %vm257_vm15, %v3341_v14, %v256_v24  ;;  %v1493_v63 = vadd.f32 %v1492_v27, %v3331_v61  ;;  %v1514_v26 = vadd.f32 %v1513_v8, %v3388_v45  ;;  %vm259_vm2 = vcmp.eq.f32.partialorder %v3341_v14, 0.0 }
  0xab   :  { %v1539_v44 = vrot.slane %v1538_v46, 2  ;;  %v1521_v49 = vadd.f32 %v1520_v38, %v1519_v59  ;;  %2799 = vmatmul.mubr.msk.f32.gmra.mxu0 %vm297_vm3, %v254_v32  ;;  %v261_v57 = vsel %vm259_vm2, %v260_v41, %v258_v13  ;;  %vm264_vm4 = vcmp.eq.f32.partialorder %v3351_v33, inf }
  0xac   :  { %vm1563_vm5 = vcmask 1045509   ;;  %410 = vmatprep.mubr.f32.mxu0 %v3098_v11  ;;  %v1528_v22 = vadd.f32 %v1527_v39, %v1526_v62  ;;  %v1534_v52 = vrot.slane %v1533_v28, 1  ;;  %v1556_v35 = vsel %vm1555_vm7, %v1500_v40, %v1493_v63 }
  0xad   :  { %v1540_v60 = vadd.f32 %v1539_v44, %v1538_v46  ;;  %v265_v61 = vsel %vm264_vm4, %v3351_v33, %v263_v54  ;;  %v270_v27 = vmul.f32 %v3071_v34, %v3366_v5  ;;  %v1558_v14 = vsel %vm1557_vm9, %v1507_v1, %v1556_v35 }
  0xae   :  { %vm1565_vm6 = vcmask 1046534   ;;  %v267_v45 = vand.u32 2147483648, %v3351_v33  ;;  %v1535_v59 = vadd.f32 %v1534_v52, %v1533_v28  ;;  %v1560_v42 = vsel %vm1559_vm10, %v1514_v26, %v1558_v14 }
  0xaf   :  { %v1541_v2 = vrot.slane %v1540_v60, 1  ;;  %2800 = vmatmul.mubr.msk.f32.gmra.mxu0 %vm297_vm3, %v261_v57  ;;  %vm266_vm8 = vcmp.eq.f32.partialorder %v3351_v33, 0.0  ;;  %v1562_v62 = vsel %vm1561_vm11, %v1521_v49, %v1560_v42  ;;  %vm4610_vm12 = vcmask 1047559  }
  0xb0   :  { %v3073_v40 = vpop.eup %3072  ;;  %416 = vmatprep.mubr.f32.mxu0 %v3098_v11  ;;  %v268_v0 = vsel %vm266_vm8, %v267_v45, %v265_v61  ;;  %vm271_vm13 = vcmp.eq.f32.partialorder %v3366_v5, inf  ;;  %v1564_v6 = vsel %vm1563_vm5, %v1528_v22, %v1562_v62  ;;  %v274_v33 = vand.u32 2147483648, %v3366_v5 }
  0xb1   :  { %v1542_v4 = vadd.f32 %v1541_v2, %v1540_v60  ;;  %v272_v7 = vsel %vm271_vm13, %v3366_v5, %v270_v27  ;;  %v1566_v8 = vsel %vm1565_vm6, %v1535_v59, %v1564_v6  ;;  %v277_v15 = vmul.f32 %v3073_v40, %v3401_v50 }
  0xb2   :  { %vm273_vm14 = vcmp.eq.f32.partialorder %v3366_v5, 0.0  ;;  %vm278_vm15 = vcmp.eq.f32.partialorder %v3401_v50, inf  ;;  %v281_v38 = vand.u32 2147483648, %v3401_v50  ;;  %vm280_vm2 = vcmp.eq.f32.partialorder %v3401_v50, 0.0 }
  0xb3   :  { %v1568_v53 = vsel %vm4610_vm12, %v1542_v4, %v1566_v8  ;;  %2801 = vmatmul.mubr.msk.f32.gmra.mxu0 %vm297_vm3, %v268_v0  ;;  %v275_v25 = vsel %vm273_vm14, %v274_v33, %v272_v7  ;;  %v279_v5 = vsel %vm278_vm15, %v3401_v50, %v277_v15  ;;  %v3100_v47 = vmov 1966171168  }
  0xb4   :  { %2962 = vmatmul.mubr.msk.f32.vlgmr.msra.gmra.mxu1 %vm1486_vm1, %v1568_v53  ;;  %422 = vmatprep.mubr.f32.mxu0 %v3098_v11  ;;  %v282_v39 = vsel %vm280_vm2, %v281_v38, %v279_v5  ;;  %v3541_v12 = vrot.slane %v285_v16, %v3222_v21  ;;  %vm4609_vm4 = vcmask 253952   ;;  %vm826_vm8 = vcmask 516096  }
  0xb5   :  { %2965 = vmatpush3.msra.mxu1 %v3210_v17  ;;  %2972 = vmatprep.mubr.msk.f32.mxu1 %vm1486_vm1, %v1478_v51  ;;  %v1641_v17 = vld [vmem:[%s4602_s4] sm:$0xff]  ;;  %v2871_v51 = vld [vmem:[%s4602_s4 + $0x30] sm:$0xff]  ;;  %vm3604_vm13 = vcmp.lt.s32.totalorder %v91_v18, 160  ;;  %vm3630_vm14 = vcmp.lt.s32.totalorder %v91_v18, 224  ;;  %vm3809_vm15 = vcmp.lt.s32.totalorder %v91_v18, 192  ;;  %vm1241_vm2 = vcmask 778496  }
  0xb6   :  { %2966 = vmatprep.subr.mxu1 %v1643_v23  ;;  %2997 = vmatprep.subr.mxu0 %v2871_v51 }
  0xb7   :  { %2967 = vmatpush3.msra.mxu1 %v1643_v23  ;;  %2802 = vmatmul.mubr.msk.f32.gmra.mxu0 %vm297_vm3, %v275_v25 }
  0xb8   :  { %2968 = vmatprep.subr.mxu1 %v1642_v37  ;;  %428 = vmatprep.mubr.f32.mxu0 %v3098_v11 }
  0xb9   :  { %2969 = vmatpush3.msra.mxu1 %v1642_v37  ;;  %2998 = vmatpush3.msra.mxu0 %v2871_v51 }
  0xba   :  { %2970 = vmatprep.subr.mxu1 %v1641_v17  ;;  %2999 = vmatprep.subr.mxu0 %v2870_v3 }
  0xbb   :  { %2971 = vmatpush3.msra.mxu1 %v1641_v17  ;;  %2803 = vmatmul.mubr.msk.f32.gmra.mxu0 %vm297_vm3, %v282_v39  ;;  %vm925_vm3 = vcmask 778240  }
  0xbc   :  { %2973 = vmatmul.mubr.msk.f32.vlgmr.msra.gmra.mxu1 %vm1486_vm1, %v1479_v10  ;;  %2984 = vmatprep.subr.mxu1 %v3098_v11  ;;  %v2869_v10 = vld [vmem:[%s4602_s4 + $0x20] sm:$0xff] }
  0xbd   :  { %2975 = vmatprep.mubr.msk.f32.mxu1 %vm1486_vm1, %v1480_v36  ;;  %3000 = vmatpush3.msra.mxu0 %v2870_v3  ;;  %v2866_v36 = vld [vmem:[%s4603_s5 + $0x30] sm:$0xff] }
  0xbe   :  { %3001 = vmatprep.subr.mxu0 %v2869_v10  ;;  %2985 = vmatpush3.msra.mxu1 %v2867_v29 }
  0xbf   :  { %3002 = vmatpush3.msra.mxu0 %v2869_v10  ;;  %2986 = vmatprep.subr.mxu1 %v3098_v11 }
  0xc0   :  { %2976 = vmatmul.mubr.msk.f32.gmra.mxu1 %vm1486_vm1, %v1481_v55  ;;  %3015 = vmatprep.subr.mxu0 %v3098_v11  ;;  %v2864_v55 = vld [vmem:[%s4603_s5 + $0x20] sm:$0xff] }
  0xc1   :  { %2978 = vmatprep.mubr.msk.f32.mxu1 %vm1486_vm1, %v1482_v31  ;;  %2987 = vmatpush3.msra.mxu1 %v2866_v36  ;;  %v3538_v31 = vrot.slane %v285_v16, %v3219_v20 }
  0xc2   :  { %2988 = vmatprep.subr.mxu1 %v3098_v11 }
  0xc3   :  { %2989 = vmatpush3.msra.mxu1 %v2865_v48 }
  0xc4   :  { %2979 = vmatmul.mubr.msk.f32.gmra.mxu1 %vm1486_vm1, %v1483_v58  ;;  %2990 = vmatprep.subr.mxu1 %v3098_v11  ;;  %v469_v58 = vunpack.c.l.s4 %v3100_v47 }
  0xc5   :  { %2981 = vmatprep.mubr.msk.f32.mxu1 %vm1486_vm1, %v1484_v30  ;;  %2991 = vmatpush3.msra.mxu1 %v2864_v55 }
  0xc6   :  { %v470_v56 = vunpack.c.0.s8 %v469_v58 }
  0xc8   :  { %2982 = vmatmul.mubr.msk.f32.gmra.mxu1 %vm1486_vm1, %v1485_v9  ;;  %v3549_v21 = vsub.s32 %v470_v56, %v3216_v19 }
  0xc9   :  { %2992 = vmatprep.mubr.msk.f32.mxu1 %vm3099_vm0, %v3098_v11 }
 0x15e   :  { %v388_v30 = vpop.f32.mrf.mxu0 }
 0x15f   :  { %v389_v50 = vadd.f32 %v388_v30, %v3538_v31 }
 0x160   :  { %v390_v9 = vpop.f32.mrf.mxu0 }
 0x161   :  { %v435_v24 = vmax.f32 %v389_v50, 0.0  ;;  %v391_v28 = vadd.f32 %v390_v9, %v3541_v12 }
 0x163   :  { %v394_v46 = vpop.f32.mrf.mxu0  ;;  %v983_v32 = vrot.slane %v435_v24, 4  ;;  %v3545_v34 = vmax.f32 %v391_v28, 0.0  ;;  %v909_v13 = vrot.slane %v435_v24, 3  ;;  %v655_v54 = vrot.slane %v435_v24, 1 }
 0x164   :  { %v395_v1 = vadd.f32 %v394_v46, %v3538_v31  ;;  %v810_v63 = vrot.slane %v435_v24, 2 }
 0x165   :  { %v396_v41 = vpop.f32.mrf.mxu0  ;;  %999 = vst [vmem:[%s4608_s10 + $0x4] sm:$0x1] %v983_v32  ;;  %v934_v49 = vrot.slane %v3545_v34, 3  ;;  %926 = vst.msk [vmem:[%s4608_s10 + $0x3] sm:$0x1] %vm925_vm3, %v909_v13  ;;  %v1047_v19 = vcombine.high %v435_v24, %v3545_v34  ;;  %v1007_v45 = vrot.slane %v3545_v34, 4  ;;  %v467_v2 = vcombine.low %v435_v24, %v3545_v34 }
 0x166   :  { %v3554_v26 = vmax.f32 %v395_v1, 0.0  ;;  %v397_v44 = vadd.f32 %v396_v41, %v3541_v12  ;;  %672 = vst.msk [vmem:[%s4608_s10 + $0x1] sm:$0x1] %vm4609_vm4, %v655_v54  ;;  %v1209_v8 = vrot.slane %v3545_v34, 5  ;;  %v1348_v51 = vrot.slane %v3545_v34, 6 }
 0x167   :  { %827 = vst.msk [vmem:[%s4608_s10 + $0x2] sm:$0x1] %vm826_vm8, %v810_v63  ;;  %v400_v52 = vpop.f32.mrf.mxu0  ;;  %942 = vrot.lane.b32.xlu0 %v934_v49, %s3101_s24  ;;  %v3578_v61 = vrot.slane %v1047_v19, %v3549_v21  ;;  %v474_v33 = vrot.slane %v467_v2, %v3549_v21 }
 0x168   :  { %v984_v57 = vrot.slane %v3554_v26, 4  ;;  %v3572_v22 = vmax.f32 %v397_v44, 0.0  ;;  %v910_v60 = vrot.slane %v3554_v26, 3  ;;  %v401_v35 = vadd.f32 %v400_v52, %v3538_v31 }
 0x169   :  { %v656_v27 = vrot.slane %v3554_v26, 1  ;;  %v402_v14 = vpop.f32.mrf.mxu0  ;;  %v1055_v40 = vcombine.high %v3578_v61, %v3578_v61  ;;  %v680_v10 = vcombine.high %v474_v33, %v474_v33  ;;  %v3644_v48 = vrot.slane %v474_v33, %v3549_v21 }
 0x16a   :  { %1000 = vst [vmem:[%s4608_s10 + $0x14] sm:$0x1] %v984_v57  ;;  %v935_v59 = vrot.slane %v3572_v22, 3  ;;  %927 = vst.msk [vmem:[%s4608_s10 + $0x13] sm:$0x1] %vm925_vm3, %v910_v60  ;;  %v3591_v42 = vmax.f32 %v401_v35, 0.0  ;;  %v482_v37 = vcombine.low %v3554_v26, %v3572_v22  ;;  %v403_v5 = vadd.f32 %v402_v14, %v3541_v12 }
 0x16b   :  { %673 = vst.msk [vmem:[%s4608_s10 + $0x11] sm:$0x1] %vm4609_vm4, %v656_v27  ;;  %v406_v62 = vpop.f32.mrf.mxu0  ;;  %1015 = vrot.lane.b32.xlu0 %v1007_v45, %s3101_s24  ;;  %v1008_v15 = vrot.slane %v3572_v22, 4  ;;  %v1062_v53 = vrot.slane %v1055_v40, %v3549_v21  ;;  %v1210_v3 = vrot.slane %v3572_v22, 5  ;;  %v1063_v55 = vcombine.high %v3554_v26, %v3572_v22 }
 0x16c   :  { %944 = vrot.lane.b32.xlu1 %v935_v59, %s3101_s24  ;;  %v985_v0 = vrot.slane %v3591_v42, 4  ;;  %v407_v4 = vadd.f32 %v406_v62, %v3538_v31  ;;  %v489_v58 = vrot.slane %v482_v37, %v3549_v21  ;;  %v3656_v30 = vmax.f32 %v403_v5, 0.0  ;;  %v3709_v5 = vld [vmem:[%s4604_s6] ss:$0 sm:$0xff] }
 0x16d   :  { %v408_v7 = vpop.f32.mrf.mxu0  ;;  %2827 = vst.msk [vmem:[%s4608_s10 + $0x5] ss:$8 sm:$0x3] %vm3604_vm13, %v1062_v53  ;;  %v1389_v29 = vcombine.high %v1062_v53, %v1062_v53  ;;  %v1349_v28 = vrot.slane %v3572_v22, 6  ;;  %v687_v34 = vrot.slane %v680_v10, %v3549_v21  ;;  %v835_v41 = vcombine.high %v3644_v48, %v3644_v48 }
 0x16e   :  { %1001 = vst [vmem:[%s4608_s10 + $0x24] sm:$0x1] %v985_v0  ;;  %v3615_v23 = vmax.f32 %v407_v4, 0.0  ;;  %v3674_v54 = vrot.slane %v1063_v55, %v3549_v21  ;;  %v409_v63 = vadd.f32 %v408_v7, %v3541_v12  ;;  %v688_v19 = vcombine.high %v489_v58, %v489_v58 }
 0x16f   :  { %v412_v25 = vpop.f32.mrf.mxu0  ;;  %1217 = vrot.lane.b32.xlu0 %v1209_v8, %s3101_s24  ;;  %2843 = vst.msk [vmem:[%s4608_s10 + $0x7] ss:$8 sm:$0x3] %vm3630_vm14, %v1389_v29  ;;  %v936_v60 = vrot.slane %v3656_v30, 3  ;;  %v496_v14 = vrot.slane %v489_v58, %v3549_v21  ;;  %v1009_v59 = vrot.slane %v3656_v30, 4  ;;  %v1211_v62 = vrot.slane %v3656_v30, 5 }
 0x170   :  { %1017 = vrot.lane.b32.xlu1 %v1008_v15, %s3101_s24  ;;  %v986_v38 = vrot.slane %v3615_v23, 4  ;;  %v413_v17 = vadd.f32 %v412_v25, %v3538_v31  ;;  %v1350_v40 = vrot.slane %v3656_v30, 6  ;;  %v497_v0 = vcombine.low %v3591_v42, %v3656_v30 }
 0x171   :  { %v3634_v43 = vpop.f32.mrf.mxu0  ;;  %v3698_v4 = vmax.f32 %v409_v63, 0.0  ;;  %v695_v8 = vrot.slane %v688_v19, %v3549_v21  ;;  %v836_v10 = vcombine.high %v496_v14, %v496_v14 }
 0x172   :  { %1002 = vst [vmem:[%s4608_s10 + $0x34] sm:$0x1] %v986_v38  ;;  %v3641_v36 = vmax.f32 %v413_v17, 0.0  ;;  %v3716_v55 = vadd.f32 %v3634_v43, %v3541_v12  ;;  %v3736_v19 = vrot.slane %v497_v0, %v3549_v21 }
 0x173   :  { %v418_v16 = vpop.f32.mrf.mxu0  ;;  %1356 = vrot.lane.b32.xlu0 %v1348_v51, %s3101_s24  ;;  %v937_v43 = vrot.slane %v3698_v4, 3 }
 0x174   :  { %1219 = vrot.lane.b32.xlu1 %v1210_v3, %s3101_s24  ;;  %v1637_v47 = vpop.f32.mrf.mxu1  ;;  %v987_v50 = vrot.slane %v3641_v36, 4  ;;  %v419_v56 = vadd.f32 %v418_v16, %v3538_v31 }
 0x175   :  { %v1775_v9 = vcombine.high %v1637_v47, %v1637_v47  ;;  %v3660_v24 = vpop.f32.mrf.mxu0  ;;  %v1782_v46 = vrot.slane %v1637_v47, %v3549_v21  ;;  %v1071_v47 = vcombine.high %v3674_v54, %v3674_v54 }
 0x176   :  { %v2963_v32 = vpop.f32.mrf.mxu1  ;;  %1003 = vst [vmem:[%s4608_s10 + $0x44] sm:$0x1] %v987_v50  ;;  %v3668_v1 = vmax.f32 %v419_v56, 0.0 }
 0x177   :  { %v1789_v13 = vrot.slane %v1775_v9, %v3549_v21  ;;  %v424_v44 = vpop.f32.mrf.mxu0  ;;  %587 = vrot.lane.b32.xlu0 %v3644_v48, %s3101_s24  ;;  %v1790_v49 = vcombine.high %v1782_v46, %v1782_v46  ;;  %v1798_v52 = vrot.slane %v1782_v46, %v3549_v21  ;;  %v1010_v9 = vrot.slane %v3698_v4, 4 }
 0x178   :  { %1358 = vrot.lane.b32.xlu1 %v1349_v28, %s3101_s24  ;;  %v988_v57 = vrot.slane %v3668_v1, 4  ;;  %v425_v22 = vadd.f32 %v424_v44, %v3538_v31 }
 0x179   :  { %v3684_v35 = vpop.f32.mrf.mxu0  ;;  %v1791_v27 = vcombine.high %v1789_v13, %v1789_v13  ;;  %v1812_v45 = vrot.slane %v1790_v49, %v3549_v21  ;;  %v1827_v38 = vrot.slane %v1798_v52, %v3219_v20  ;;  %v1820_v17 = vcombine.high %v1798_v52, %v1798_v52 }
 0x17a   :  { %1004 = vst [vmem:[%s4608_s10 + $0x54] sm:$0x1] %v988_v57  ;;  %v3692_v2 = vmax.f32 %v425_v22, 0.0  ;;  %v1805_v56 = vrot.slane %v1789_v13, %v3549_v21  ;;  %v1212_v49 = vrot.slane %v3698_v4, 5  ;;  %v1351_v52 = vrot.slane %v3698_v4, 6 }
 0x17b   :  { %v430_v7 = vpop.f32.mrf.mxu0  ;;  %744 = vrot.lane.b32.xlu0 %v687_v34, %s3101_s24  ;;  %v1831_v33 = vrot.slane %v1812_v45, %v3219_v20  ;;  %v1822_v53 = vcombine.high %v1812_v45, %v1812_v45  ;;  %v1819_v48 = vrot.slane %v1791_v27, %v3549_v21  ;;  %v1835_v34 = vrot.slane %v1820_v17, %v3219_v20 }
 0x17c   :  { %589 = vrot.lane.b32.xlu1 %v496_v14, %s3101_s24  ;;  %v2974_v15 = vpop.f32.mrf.mxu1  ;;  %v989_v25 = vrot.slane %v3692_v2, 4  ;;  %v431_v37 = vadd.f32 %v430_v7, %v3538_v31  ;;  %v1843_v0 = vrot.slane %v1805_v56, %v3219_v20  ;;  %v1821_v7 = vcombine.high %v1805_v56, %v1805_v56 }
 0x17d   :  { %v1865_v51 = vadd.f32 %v2974_v15, %v1831_v33  ;;  %v1839_v29 = vrot.slane %v1822_v53, %v3219_v20  ;;  %v1823_v44 = vcombine.high %v1819_v48, %v1819_v48  ;;  %v1847_v45 = vrot.slane %v1819_v48, %v3219_v20 }
 0x17e   :  { %v1735_v3 = vpop.f32.mrf.mxu1  ;;  %1005 = vst [vmem:[%s4608_s10 + $0x64] sm:$0x1] %v989_v25  ;;  %v3721_v31 = vmax.f32 %v431_v37, 0.0  ;;  %v512_v17 = vcombine.low %v3615_v23, %v3698_v4  ;;  %v1851_v56 = vrot.slane %v1821_v7, %v3219_v20  ;;  %v3774_v7 = vrot.slane %v3736_v19, %v3549_v21 }
 0x17f   :  { %v1864_v16 = vadd.f32 %v1827_v38, %v1735_v3  ;;  %843 = vrot.lane.b32.xlu0 %v835_v41, %s3101_s24  ;;  %v1880_v58 = vadd.f32 %v3709_v5, %v1865_v51 }
 0x180   :  { %746 = vrot.lane.b32.xlu1 %v695_v8, %s3101_s24  ;;  %v2977_v50 = vpop.f32.mrf.mxu1  ;;  %v990_v28 = vrot.slane %v3721_v31, 4 }
 0x181   :  { %v1879_v46 = vadd.f32 %v3709_v5, %v1864_v16  ;;  %v1867_v32 = vadd.f32 %v2977_v50, %v1839_v29  ;;  %v1888_v63 = vmax.f32 %v1880_v58, 0.0 }
 0x182   :  { %v1745_v41 = vpop.f32.mrf.mxu1  ;;  %1006 = vst [vmem:[%s4608_s10 + $0x74] sm:$0x1] %v990_v28 }
 0x183   :  { %v1887_v13 = vmax.f32 %v1879_v46, 0.0  ;;  %v1882_v57 = vadd.f32 %v3709_v5, %v1867_v32  ;;  %v1866_v22 = vadd.f32 %v1835_v34, %v1745_v41  ;;  %v1902_v27 = vsel %vm1486_vm1, %v1888_v63, 0.0  ;;  %946 = vrot.lane.b32.xlu0 %v936_v60, %s3101_s24 }
 0x184   :  { %845 = vrot.lane.b32.xlu1 %v836_v10, %s3101_s24  ;;  %v2980_v14 = vpop.f32.mrf.mxu1  ;;  %v1903_v8 = vrot.slane %v1902_v27, 4  ;;  %v1855_v60 = vrot.slane %v1823_v44, %v3219_v20 }
 0x185   :  { %v1895_v15 = vsel %vm1486_vm1, %v1887_v13, 0.0  ;;  %v1890_v33 = vmax.f32 %v1882_v57, 0.0  ;;  %v1881_v53 = vadd.f32 %v3709_v5, %v1866_v22  ;;  %3003 = vmatprep.mubr.msk.f32.mxu0 %vm1486_vm1, %v1887_v13  ;;  %v1869_v37 = vadd.f32 %v2980_v14, %v1847_v45 }
 0x186   :  { %v1896_v25 = vrot.slane %v1895_v15, 4  ;;  %v1755_v38 = vpop.f32.mrf.mxu1  ;;  %3004 = vmatmul.mubr.msk.f32.vlgmr.msra.gmra.mxu0 %vm1486_vm1, %v1888_v63  ;;  %v1904_v51 = vadd.f32 %v1903_v8, %v1902_v27 }
 0x187   :  { %v1916_v3 = vsel %vm1486_vm1, %v1890_v33, 0.0  ;;  %v1889_v10 = vmax.f32 %v1881_v53, 0.0  ;;  %v1868_v29 = vadd.f32 %v1843_v0, %v1755_v38  ;;  %1019 = vrot.lane.b32.xlu0 %v1009_v59, %s3101_s24  ;;  %v1884_v58 = vadd.f32 %v3709_v5, %v1869_v37 }
 0x188   :  { %v1897_v48 = vadd.f32 %v1896_v25, %v1895_v15  ;;  %v1917_v16 = vrot.slane %v1916_v3, 4  ;;  %948 = vrot.lane.b32.xlu1 %v937_v43, %s3101_s24  ;;  %v2983_v50 = vpop.f32.mrf.mxu1  ;;  %v1905_v28 = vrot.slane %v1904_v51, 2 }
 0x189   :  { %v1909_v46 = vsel %vm1486_vm1, %v1889_v10, 0.0  ;;  %v1883_v32 = vadd.f32 %v3709_v5, %v1868_v29  ;;  %v1871_v34 = vadd.f32 %v2983_v50, %v1855_v60  ;;  %3006 = vmatprep.mubr.msk.f32.mxu0 %vm1486_vm1, %v1889_v10  ;;  %v1892_v13 = vmax.f32 %v1884_v58, 0.0 }
 0x18a   :  { %v1898_v63 = vrot.slane %v1897_v48, 2  ;;  %v1918_v41 = vadd.f32 %v1917_v16, %v1916_v3  ;;  %v1910_v44 = vrot.slane %v1909_v46, 4  ;;  %v1765_v59 = vpop.f32.mrf.mxu1  ;;  %3007 = vmatmul.mubr.msk.f32.gmra.mxu0 %vm1486_vm1, %v1890_v33  ;;  %v1906_v43 = vadd.f32 %v1905_v28, %v1904_v51  ;;  %v432_v16 = vpop.f32.mrf.mxu0 }
 0x18b   :  { %v1891_v57 = vmax.f32 %v1883_v32, 0.0  ;;  %v1886_v22 = vadd.f32 %v3709_v5, %v1871_v34  ;;  %v1870_v27 = vadd.f32 %v1851_v56, %v1765_v59  ;;  %v1930_v0 = vsel %vm1486_vm1, %v1892_v13, 0.0  ;;  %1221 = vrot.lane.b32.xlu0 %v1211_v62, %s3101_s24 }
 0x18c   :  { %v1899_v14 = vadd.f32 %v1898_v63, %v1897_v48  ;;  %v1911_v45 = vadd.f32 %v1910_v44, %v1909_v46  ;;  %1021 = vrot.lane.b32.xlu1 %v1010_v9, %s3101_s24  ;;  %v1919_v8 = vrot.slane %v1918_v41, 2  ;;  %v1931_v15 = vrot.slane %v1930_v0, 4 }
 0x18d   :  { %v1923_v33 = vsel %vm1486_vm1, %v1891_v57, 0.0  ;;  %v1894_v53 = vmax.f32 %v1886_v22, 0.0  ;;  %3009 = vmatprep.mubr.msk.f32.mxu0 %vm1486_vm1, %v1891_v57  ;;  %v1907_v25 = vrot.slane %v1906_v43, 1  ;;  %v696_v62 = vcombine.high %v3736_v19, %v3736_v19 }
 0x18e   :  { %v1912_v37 = vrot.slane %v1911_v45, 2  ;;  %v1924_v38 = vrot.slane %v1923_v33, 4  ;;  %3010 = vmatmul.mubr.msk.f32.gmra.mxu0 %vm1486_vm1, %v1892_v13  ;;  %v1900_v9 = vrot.slane %v1899_v14, 1  ;;  %v1932_v60 = vadd.f32 %v1931_v15, %v1930_v0 }
 0x18f   :  { %v1944_v51 = vsel %vm1486_vm1, %v1894_v53, 0.0  ;;  %v1885_v3 = vadd.f32 %v3709_v5, %v1870_v27  ;;  %v3784_v10 = vmax.f32 %v3716_v55, 0.0  ;;  %1360 = vrot.lane.b32.xlu0 %v1350_v40, %s3101_s24  ;;  %v519_v19 = vrot.slane %v512_v17, %v3549_v21 }
 0x190   :  { %v1913_v29 = vadd.f32 %v1912_v37, %v1911_v45  ;;  %v1925_v48 = vadd.f32 %v1924_v38, %v1923_v33  ;;  %1223 = vrot.lane.b32.xlu1 %v1212_v49, %s3101_s24  ;;  %v1920_v58 = vadd.f32 %v1919_v8, %v1918_v41  ;;  %v1933_v50 = vrot.slane %v1932_v60, 2 }
 0x191   :  { %v1945_v56 = vrot.slane %v1944_v51, 4  ;;  %v1893_v5 = vmax.f32 %v1885_v3, 0.0  ;;  %v421_v55 = vadd.f32 %v3660_v24, %v3541_v12  ;;  %v427_v28 = vadd.f32 %v3684_v35, %v3541_v12 }
 0x192   :  { %v1914_v46 = vrot.slane %v1913_v29, 1  ;;  %v1926_v32 = vrot.slane %v1925_v48, 2  ;;  %v1908_v40 = vadd.f32 %v1907_v25, %v1906_v43  ;;  %v1901_v34 = vadd.f32 %v1900_v9, %v1899_v14 }
 0x193   :  { %v1946_v63 = vadd.f32 %v1945_v56, %v1944_v51  ;;  %v1937_v49 = vsel %vm1486_vm1, %v1893_v5, 0.0  ;;  %3012 = vmatprep.mubr.msk.f32.mxu0 %vm1486_vm1, %v1893_v5  ;;  %v433_v17 = vadd.f32 %v432_v16, %v3541_v12  ;;  %591 = vrot.lane.b32.xlu0 %v3774_v7, %s3101_s24  ;;  %v1921_v24 = vrot.slane %v1920_v58, 1 }
 0x194   :  { %v1915_v41 = vadd.f32 %v1914_v46, %v1913_v29  ;;  %v1927_v44 = vadd.f32 %v1926_v32, %v1925_v48  ;;  %v1938_v13 = vrot.slane %v1937_v49, 4  ;;  %1362 = vrot.lane.b32.xlu1 %v1351_v52, %s3101_s24  ;;  %v1934_v35 = vadd.f32 %v1933_v50, %v1932_v60  ;;  %3013 = vmatmul.mubr.msk.f32.gmra.mxu0 %vm1486_vm1, %v1894_v53 }
 0x195   :  { %v1947_v59 = vrot.slane %v1946_v63, 2  ;;  %v703_v43 = vrot.slane %v696_v62, %v3549_v21  ;;  %v526_v12 = vrot.slane %v519_v19, %v3549_v21  ;;  %v704_v27 = vcombine.high %v519_v19, %v519_v19  ;;  %3023 = vmatprep.mubr.msk.f32.mxu0 %vm3099_vm0, %v3098_v11 }
 0x196   :  { %v1928_v57 = vrot.slane %v1927_v44, 1  ;;  %v1939_v22 = vadd.f32 %v1938_v13, %v1937_v49  ;;  %v3815_v52 = vmax.f32 %v421_v55, 0.0  ;;  %v3817_v45 = vmax.f32 %v427_v28, 0.0 }
 0x197   :  { %v1964_v0 = vsel %vm1555_vm7, %v1908_v40, %v1901_v34  ;;  %v1948_v8 = vadd.f32 %v1947_v59, %v1946_v63  ;;  %v3820_v15 = vmax.f32 %v433_v17, 0.0  ;;  %748 = vrot.lane.b32.xlu0 %v703_v43, %s3101_s24  ;;  %v1922_v37 = vadd.f32 %v1921_v24, %v1920_v58 }
 0x198   :  { %v1965_v33 = vsel %vm1557_vm9, %v1915_v41, %v1964_v0  ;;  %v1929_v53 = vadd.f32 %v1928_v57, %v1927_v44  ;;  %v1940_v25 = vrot.slane %v1939_v22, 2  ;;  %593 = vrot.lane.b32.xlu1 %v526_v12, %s3101_s24  ;;  %v1935_v38 = vrot.slane %v1934_v35, 1 }
 0x199   :  { %v938_v62 = vrot.slane %v3784_v10, 3  ;;  %v527_v9 = vcombine.low %v3641_v36, %v3784_v10  ;;  %v837_v51 = vcombine.high %v3774_v7, %v3774_v7  ;;  %v711_v3 = vrot.slane %v704_v27, %v3549_v21 }
 0x19a   :  { %v1941_v60 = vadd.f32 %v1940_v25, %v1939_v22  ;;  %v1011_v29 = vrot.slane %v3784_v10, 4  ;;  %v1966_v48 = vsel %vm1559_vm10, %v1922_v37, %v1965_v33  ;;  %v1949_v19 = vrot.slane %v1948_v8, 1 }
 0x19b   :  { %v939_v16 = vrot.slane %v3815_v52, 3  ;;  %v557_v58 = vcombine.low %v3692_v2, %v3817_v45  ;;  %v1967_v50 = vsel %vm1561_vm11, %v1929_v53, %v1966_v48  ;;  %847 = vrot.lane.b32.xlu0 %v837_v51, %s3101_s24  ;;  %v1213_v7 = vrot.slane %v3784_v10, 5 }
 0x19c   :  { %v1942_v56 = vrot.slane %v1941_v60, 1  ;;  %750 = vrot.lane.b32.xlu1 %v711_v3, %s3101_s24  ;;  %v572_v5 = vcombine.low %v3721_v31, %v3820_v15  ;;  %v1936_v55 = vadd.f32 %v1935_v38, %v1934_v35  ;;  %v3843_v28 = vrot.slane %v527_v9, %v3549_v21 }
 0x19d   :  { %v1078_v46 = vrot.slane %v1071_v47, %v3549_v21  ;;  %v1256_v32 = vrot.slane %v3578_v61, %v3549_v21  ;;  %v838_v34 = vcombine.high %v526_v12, %v526_v12  ;;  %v542_v63 = vcombine.low %v3668_v1, %v3815_v52 }
 0x19e   :  { %v1943_v40 = vadd.f32 %v1942_v56, %v1941_v60  ;;  %v1264_v49 = vrot.slane %v3674_v54, %v3549_v21  ;;  %v1950_v17 = vadd.f32 %v1949_v19, %v1948_v8  ;;  %v1968_v41 = vsel %vm1563_vm5, %v1936_v55, %v1967_v50 }
 0x19f   :  { %2828 = vst.msk [vmem:[%s4608_s10 + $0x15] ss:$8 sm:$0x3] %vm3604_vm13, %v1078_v46  ;;  %v1390_v47 = vcombine.high %v1078_v46, %v1078_v46  ;;  %v1257_v44 = vcombine.high %v1256_v32, %v1256_v32  ;;  %950 = vrot.lane.b32.xlu0 %v938_v62, %s3101_s24  ;;  %v1012_v13 = vrot.slane %v3815_v52, 4  ;;  %v1352_v54 = vrot.slane %v3784_v10, 6 }
 0x1a0   :  { %849 = vrot.lane.b32.xlu1 %v838_v34, %s3101_s24  ;;  %v1969_v61 = vsel %vm1565_vm6, %v1943_v40, %v1968_v41  ;;  %v1214_v24 = vrot.slane %v3815_v52, 5  ;;  %v3870_v59 = vrot.slane %v3843_v28, %v3549_v21  ;;  %v1353_v43 = vrot.slane %v3815_v52, 6 }
 0x1a1   :  { %v1970_v35 = vsel %vm4610_vm12, %v1950_v17, %v1969_v61  ;;  %2844 = vst.msk [vmem:[%s4608_s10 + $0x17] ss:$8 sm:$0x3] %vm3630_vm14, %v1390_v47  ;;  %v1265_v57 = vcombine.high %v1264_v49, %v1264_v49  ;;  %v712_v22 = vcombine.high %v3843_v28, %v3843_v28  ;;  %v3887_v12 = vrot.slane %v542_v63, %v3549_v21 }
 0x1a2   :  { %2835 = vst.msk [vmem:[%s4608_s10 + $0x6] ss:$8 sm:$0x3] %vm3809_vm15, %v1257_v44  ;;  %2993 = vmatmul.mubr.msk.f32.vlgmr.msra.gmra.mxu1 %vm1486_vm1, %v1970_v35  ;;  %v811_v27 = vrot.slane %v3554_v26, 2  ;;  %v911_v0 = vrot.slane %v3591_v42, 3  ;;  %v912_v8 = vrot.slane %v3615_v23, 3  ;;  %v1079_v33 = vcombine.high %v3591_v42, %v3656_v30 }
 0x1a3   :  { %2836 = vst.msk [vmem:[%s4608_s10 + $0x16] ss:$8 sm:$0x3] %vm3809_vm15, %v1265_v57  ;;  %v1095_v53 = vcombine.high %v3615_v23, %v3698_v4  ;;  %v657_v25 = vrot.slane %v3591_v42, 1  ;;  %1023 = vrot.lane.b32.xlu0 %v1011_v29, %s3101_s24  ;;  %v658_v26 = vrot.slane %v3615_v23, 1  ;;  %v812_v30 = vrot.slane %v3591_v42, 2 }
 0x1a4   :  { %952 = vrot.lane.b32.xlu1 %v939_v16, %s3101_s24  ;;  %828 = vst.msk [vmem:[%s4608_s10 + $0x12] sm:$0x1] %vm826_vm8, %v811_v27  ;;  %v813_v4 = vrot.slane %v3615_v23, 2  ;;  %v913_v37 = vrot.slane %v3641_v36, 3  ;;  %v1086_v38 = vrot.slane %v1079_v33, %v3549_v21  ;;  %v914_v42 = vrot.slane %v3668_v1, 3 }
 0x1a5   :  { %928 = vst.msk [vmem:[%s4608_s10 + $0x23] sm:$0x1] %vm925_vm3, %v911_v0  ;;  %929 = vst.msk [vmem:[%s4608_s10 + $0x33] sm:$0x1] %vm925_vm3, %v912_v8  ;;  %v1102_v62 = vrot.slane %v1095_v53, %v3549_v21  ;;  %v1111_v23 = vcombine.high %v3641_v36, %v3784_v10  ;;  %v1127_v9 = vcombine.high %v3668_v1, %v3815_v52  ;;  %v659_v60 = vrot.slane %v3641_v36, 1 }
 0x1a6   :  { %674 = vst.msk [vmem:[%s4608_s10 + $0x21] sm:$0x1] %vm4609_vm4, %v657_v25  ;;  %675 = vst.msk [vmem:[%s4608_s10 + $0x31] sm:$0x1] %vm4609_vm4, %v658_v26  ;;  %v660_v51 = vrot.slane %v3668_v1, 1  ;;  %v814_v3 = vrot.slane %v3641_v36, 2  ;;  %v1087_v29 = vcombine.high %v1086_v38, %v1086_v38  ;;  %v1272_v19 = vrot.slane %v1086_v38, %v3549_v21 }
 0x1a7   :  { %829 = vst.msk [vmem:[%s4608_s10 + $0x22] sm:$0x1] %vm826_vm8, %v812_v30  ;;  %830 = vst.msk [vmem:[%s4608_s10 + $0x32] sm:$0x1] %vm826_vm8, %v813_v4  ;;  %v1103_v48 = vcombine.high %v1102_v62, %v1102_v62  ;;  %v1280_v16 = vrot.slane %v1102_v62, %v3549_v21  ;;  %1225 = vrot.lane.b32.xlu0 %v1213_v7, %s3101_s24  ;;  %v1118_v50 = vrot.slane %v1111_v23, %v3549_v21  ;;  %vm966_vm0 = vcmask 1041152  }
 0x1a8   :  { %930 = vst.msk [vmem:[%s4608_s10 + $0x43] sm:$0x1] %vm925_vm3, %v913_v37  ;;  %931 = vst.msk [vmem:[%s4608_s10 + $0x53] sm:$0x1] %vm925_vm3, %v914_v42  ;;  %1025 = vrot.lane.b32.xlu1 %v1012_v13, %s3101_s24  ;;  %v1134_v36 = vrot.slane %v1127_v9, %v3549_v21  ;;  %v815_v56 = vrot.slane %v3668_v1, 2  ;;  %v915_v7 = vrot.slane %v3692_v2, 3  ;;  %v1094_v55 = vrot.slane %v1087_v29, %v3549_v21 }
 0x1a9   :  { %676 = vst.msk [vmem:[%s4608_s10 + $0x41] sm:$0x1] %vm4609_vm4, %v659_v60  ;;  %677 = vst.msk [vmem:[%s4608_s10 + $0x51] sm:$0x1] %vm4609_vm4, %v660_v51  ;;  %v1110_v46 = vrot.slane %v1103_v48, %v3549_v21  ;;  %v1273_v32 = vcombine.high %v1272_v19, %v1272_v19  ;;  %v1281_v40 = vcombine.high %v1280_v16, %v1280_v16  ;;  %v916_v47 = vrot.slane %v3721_v31, 3 }
 0x1aa   :  { %831 = vst.msk [vmem:[%s4608_s10 + $0x42] sm:$0x1] %vm826_vm8, %v814_v3  ;;  %v1119_v34 = vcombine.high %v1118_v50, %v1118_v50  ;;  %v1135_v63 = vcombine.high %v1134_v36, %v1134_v36  ;;  %v1288_v49 = vrot.slane %v1118_v50, %v3549_v21  ;;  %v1296_v17 = vrot.slane %v1134_v36, %v3549_v21 }
 0x1ab   :  { %832 = vst.msk [vmem:[%s4608_s10 + $0x52] sm:$0x1] %vm826_vm8, %v815_v56  ;;  %v1391_v1 = vcombine.high %v1094_v55, %v1094_v55  ;;  %v1392_v41 = vcombine.high %v1110_v46, %v1110_v46  ;;  %v1143_v44 = vcombine.high %v3692_v2, %v3817_v45  ;;  %1364 = vrot.lane.b32.xlu0 %v1352_v54, %s3101_s24  ;;  %v661_v57 = vrot.slane %v3692_v2, 1 }
 0x1ac   :  { %932 = vst.msk [vmem:[%s4608_s10 + $0x63] sm:$0x1] %vm925_vm3, %v915_v7  ;;  %1227 = vrot.lane.b32.xlu1 %v1214_v24, %s3101_s24  ;;  %v1126_v61 = vrot.slane %v1119_v34, %v3549_v21  ;;  %v1142_v13 = vrot.slane %v1135_v63, %v3549_v21  ;;  %v1289_v35 = vcombine.high %v1288_v49, %v1288_v49  ;;  %933 = vst.msk [vmem:[%s4608_s10 + $0x73] sm:$0x1] %vm925_vm3, %v916_v47 }
 0x1ad   :  { %2829 = vst.msk [vmem:[%s4608_s10 + $0x25] ss:$8 sm:$0x3] %vm3604_vm13, %v1094_v55  ;;  %2830 = vst.msk [vmem:[%s4608_s10 + $0x35] ss:$8 sm:$0x3] %vm3604_vm13, %v1110_v46  ;;  %v1297_v10 = vcombine.high %v1296_v17, %v1296_v17  ;;  %v1150_v54 = vrot.slane %v1143_v44, %v3549_v21  ;;  %v1159_v24 = vcombine.high %v3721_v31, %v3820_v15 }
 0x1ae   :  { %2837 = vst.msk [vmem:[%s4608_s10 + $0x26] ss:$8 sm:$0x3] %vm3809_vm15, %v1273_v32  ;;  %2838 = vst.msk [vmem:[%s4608_s10 + $0x36] ss:$8 sm:$0x3] %vm3809_vm15, %v1281_v40  ;;  %v1393_v0 = vcombine.high %v1126_v61, %v1126_v61  ;;  %v1394_v8 = vcombine.high %v1142_v13, %v1142_v13  ;;  %v719_v38 = vrot.slane %v712_v22, %v3549_v21 }
 0x1af   :  { %2845 = vst.msk [vmem:[%s4608_s10 + $0x27] ss:$8 sm:$0x3] %vm3630_vm14, %v1391_v1  ;;  %2846 = vst.msk [vmem:[%s4608_s10 + $0x37] ss:$8 sm:$0x3] %vm3630_vm14, %v1392_v41  ;;  %v1151_v25 = vcombine.high %v1150_v54, %v1150_v54  ;;  %v1166_v26 = vrot.slane %v1159_v24, %v3549_v21  ;;  %v1304_v30 = vrot.slane %v1150_v54, %v3549_v21  ;;  %595 = vrot.lane.b32.xlu0 %v3870_v59, %s3101_s24 }
 0x1b0   :  { %v662_v27 = vrot.slane %v3721_v31, 1  ;;  %2831 = vst.msk [vmem:[%s4608_s10 + $0x45] ss:$8 sm:$0x3] %vm3604_vm13, %v1126_v61  ;;  %v816_v33 = vrot.slane %v3692_v2, 2  ;;  %v817_v53 = vrot.slane %v3721_v31, 2  ;;  %1366 = vrot.lane.b32.xlu1 %v1353_v43, %s3101_s24  ;;  %v556_v62 = vrot.slane %v3887_v12, %v3549_v21 }
 0x1b1   :  { %2832 = vst.msk [vmem:[%s4608_s10 + $0x55] ss:$8 sm:$0x3] %vm3604_vm13, %v1142_v13  ;;  %v1158_v52 = vrot.slane %v1151_v25, %v3549_v21  ;;  %v1167_v43 = vcombine.high %v1166_v26, %v1166_v26  ;;  %v1305_v4 = vcombine.high %v1304_v30, %v1304_v30  ;;  %v1312_v37 = vrot.slane %v1166_v26, %v3549_v21  ;;  %v2891_v13 = vld [vmem:[%s4602_s4 + $0x58] sm:$0xff]  ;;  %v2889_v24 = vld [vmem:[%s4602_s4 + $0x48] sm:$0xff] }
 0x1b2   :  { %2839 = vst.msk [vmem:[%s4608_s10 + $0x46] ss:$8 sm:$0x3] %vm3809_vm15, %v1289_v35  ;;  %2840 = vst.msk [vmem:[%s4608_s10 + $0x56] ss:$8 sm:$0x3] %vm3809_vm15, %v1297_v10  ;;  %v720_v42 = vcombine.high %v3887_v12, %v3887_v12  ;;  %v839_v12 = vcombine.high %v3870_v59, %v3870_v59  ;;  %v840_v6 = vcombine.high %v556_v62, %v556_v62  ;;  %3026 = vmatprep.subr.mxu1 %v2891_v13 }
 0x1b3   :  { %678 = vst.msk [vmem:[%s4608_s10 + $0x61] sm:$0x1] %vm4609_vm4, %v661_v57  ;;  %679 = vst.msk [vmem:[%s4608_s10 + $0x71] sm:$0x1] %vm4609_vm4, %v662_v27  ;;  %v1395_v23 = vcombine.high %v1158_v52, %v1158_v52  ;;  %v1174_v9 = vrot.slane %v1167_v43, %v3549_v21  ;;  %v1313_v28 = vcombine.high %v1312_v37, %v1312_v37  ;;  %752 = vrot.lane.b32.xlu0 %v719_v38, %s3101_s24  ;;  %v2890_v35 = vld [vmem:[%s4602_s4 + $0x50] sm:$0xff] }
 0x1b4   :  { %2847 = vst.msk [vmem:[%s4608_s10 + $0x47] ss:$8 sm:$0x3] %vm3630_vm14, %v1393_v0  ;;  %2848 = vst.msk [vmem:[%s4608_s10 + $0x57] ss:$8 sm:$0x3] %vm3630_vm14, %v1394_v8  ;;  %597 = vrot.lane.b32.xlu1 %v556_v62, %s3101_s24  ;;  %v727_v60 = vrot.slane %v720_v42, %v3549_v21  ;;  %v564_v48 = vrot.slane %v557_v58, %v3549_v21  ;;  %v579_v36 = vrot.slane %v572_v5, %v3549_v21 }
 0x1b5   :  { %833 = vst.msk [vmem:[%s4608_s10 + $0x62] sm:$0x1] %vm826_vm8, %v816_v33  ;;  %834 = vst.msk [vmem:[%s4608_s10 + $0x72] sm:$0x1] %vm826_vm8, %v817_v53  ;;  %v1396_v22 = vcombine.high %v1174_v9, %v1174_v9  ;;  %v940_v14 = vrot.slane %v3817_v45, 3  ;;  %v1013_v59 = vrot.slane %v3817_v45, 4  ;;  %3027 = vmatpush3.msra.mxu1 %v2891_v13 }
 0x1b6   :  { %2833 = vst.msk [vmem:[%s4608_s10 + $0x65] ss:$8 sm:$0x3] %vm3604_vm13, %v1158_v52  ;;  %2834 = vst.msk [vmem:[%s4608_s10 + $0x75] ss:$8 sm:$0x3] %vm3604_vm13, %v1174_v9  ;;  %v571_v19 = vrot.slane %v564_v48, %v3549_v21  ;;  %v728_v50 = vcombine.high %v564_v48, %v564_v48  ;;  %v586_v58 = vrot.slane %v579_v36, %v3549_v21  ;;  %3028 = vmatprep.subr.mxu1 %v2890_v35 }
 0x1b7   :  { %2841 = vst.msk [vmem:[%s4608_s10 + $0x66] ss:$8 sm:$0x3] %vm3809_vm15, %v1305_v4  ;;  %2842 = vst.msk [vmem:[%s4608_s10 + $0x76] ss:$8 sm:$0x3] %vm3809_vm15, %v1313_v28  ;;  %851 = vrot.lane.b32.xlu0 %v839_v12, %s3101_s24  ;;  %v736_v56 = vcombine.high %v579_v36, %v579_v36  ;;  %3029 = vmatpush3.msra.mxu1 %v2890_v35 }
 0x1b8   :  { %2849 = vst.msk [vmem:[%s4608_s10 + $0x67] ss:$8 sm:$0x3] %vm3630_vm14, %v1395_v23  ;;  %2850 = vst.msk [vmem:[%s4608_s10 + $0x77] ss:$8 sm:$0x3] %vm3630_vm14, %v1396_v22  ;;  %754 = vrot.lane.b32.xlu1 %v727_v60, %s3101_s24  ;;  %v735_v2 = vrot.slane %v728_v50, %v3549_v21  ;;  %v841_v7 = vcombine.high %v571_v19, %v571_v19  ;;  %v842_v5 = vcombine.high %v586_v58, %v586_v58 }
 0x1b9   :  { %v941_v51 = vrot.slane %v3820_v15, 3  ;;  %v1215_v3 = vrot.slane %v3817_v45, 5  ;;  %v1014_v29 = vrot.slane %v3820_v15, 4  ;;  %v1216_v16 = vrot.slane %v3820_v15, 5  ;;  %v2888_v33 = vld [vmem:[%s4602_s4 + $0x40] sm:$0xff]  ;;  %3030 = vmatprep.subr.mxu1 %v2889_v24  ;;  %v2886_v28 = vld [vmem:[%s4603_s5 + $0x58] sm:$0xff] }
 0x1ba   :  { %v743_v55 = vrot.slane %v736_v56, %v3549_v21  ;;  %v1354_v31 = vrot.slane %v3817_v45, 6  ;;  %v1355_v46 = vrot.slane %v3820_v15, 6  ;;  %vm1380_vm8 = vcmask 778752   ;;  %3031 = vmatpush3.msra.mxu1 %v2889_v24  ;;  %v2885_v22 = vld [vmem:[%s4603_s5 + $0x50] sm:$0xff]  ;;  %3016 = vmatpush3.msra.mxu0 %v2886_v28 }
 0x1bb   :  { %954 = vrot.lane.b32.xlu0 %v940_v14, %s3101_s24  ;;  %vm611_vm13 = vcmask 785408   ;;  %vm784_vm15 = vcmp.ge.s32.totalorder %v91_v18, 32  ;;  %vm883_vm12 = vcmp.ge.s32.totalorder %v91_v18, 64  ;;  %3032 = vmatprep.subr.mxu1 %v2888_v33  ;;  %v2883_v14 = vld [vmem:[%s4603_s5 + $0x40] sm:$0xff] }
 0x1bc   :  { %853 = vrot.lane.b32.xlu1 %v840_v6, %s3101_s24  ;;  %vm4231_vm4 = vmand %vm784_vm15, %vm3630_vm14  ;;  %3033 = vmatpush3.msra.mxu1 %v2888_v33  ;;  %v2884_v6 = vld [vmem:[%s4603_s5 + $0x48] sm:$0xff] }
 0x1bd   :  { %vm4256_vm15 = vmand %vm883_vm12, %vm3630_vm14  ;;  %3017 = vmatprep.subr.mxu0 %v3098_v11  ;;  %vm4621_vm12 = vcmask 1047559  }
 0x1be   :  { %3018 = vmatpush3.msra.mxu0 %v2885_v22 }
 0x1bf   :  { %1027 = vrot.lane.b32.xlu0 %v1013_v59, %s3101_s24  ;;  %3019 = vmatprep.subr.mxu0 %v3098_v11 }
 0x1c0   :  { %956 = vrot.lane.b32.xlu1 %v941_v51, %s3101_s24  ;;  %3020 = vmatpush3.msra.mxu0 %v2884_v6 }
 0x1c1   :  { %3021 = vmatprep.subr.mxu0 %v3098_v11 }
 0x1c2   :  { %3022 = vmatpush3.msra.mxu0 %v2883_v14 }
 0x1c3   :  { %1229 = vrot.lane.b32.xlu0 %v1215_v3, %s3101_s24 }
 0x1c4   :  { %1029 = vrot.lane.b32.xlu1 %v1014_v29, %s3101_s24 }
 0x1c7   :  { %599 = vrot.lane.b32.xlu0 %v571_v19, %s3101_s24 }
 0x1c8   :  { %1231 = vrot.lane.b32.xlu1 %v1216_v16, %s3101_s24 }
 0x1cb   :  { %756 = vrot.lane.b32.xlu0 %v735_v2, %s3101_s24 }
 0x1cc   :  { %601 = vrot.lane.b32.xlu1 %v586_v58, %s3101_s24 }
 0x1cf   :  { %855 = vrot.lane.b32.xlu0 %v841_v7, %s3101_s24 }
 0x1d0   :  { %758 = vrot.lane.b32.xlu1 %v743_v55, %s3101_s24 }
 0x1d3   :  { %1368 = vrot.lane.b32.xlu0 %v1354_v31, %s3101_s24 }
 0x1d4   :  { %857 = vrot.lane.b32.xlu1 %v842_v5, %s3101_s24 }
 0x1d8   :  { %1370 = vrot.lane.b32.xlu1 %v1355_v46, %s3101_s24 }
 0x1d9   :  { %v943_v32 = vpop.permute.xlu0 %942 }
 0x1da   :  { %967 = vst.msk [vmem:[%s4608_s10 + $0x3] sm:$0x1] %vm966_vm0, %v943_v32 }
 0x1db   :  { %968 = vst.msk [vmem:[%s4608_s10 + $0xb] sm:$0x1] %vm925_vm3, %v943_v32 }
 0x1dd   :  { %v1016_v40 = vpop.permute.xlu0 %1015 }
 0x1de   :  { %v945_v45 = vpop.permute.xlu1 %944  ;;  %1039 = vst.msk [vmem:[%s4608_s10 + $0xc] sm:$0x1] %vm925_vm3, %v1016_v40 }
 0x1df   :  { %969 = vst.msk [vmem:[%s4608_s10 + $0x13] sm:$0x1] %vm966_vm0, %v945_v45 }
 0x1e0   :  { %970 = vst.msk [vmem:[%s4608_s10 + $0x1b] sm:$0x1] %vm925_vm3, %v945_v45 }
 0x1e1   :  { %v1218_v34 = vpop.permute.xlu0 %1217 }
 0x1e2   :  { %v1018_v15 = vpop.permute.xlu1 %1017  ;;  %1242 = vst.msk [vmem:[%s4608_s10 + $0xd] sm:$0x1] %vm1241_vm2, %v1218_v34 }
 0x1e3   :  { %1040 = vst.msk [vmem:[%s4608_s10 + $0x1c] sm:$0x1] %vm925_vm3, %v1018_v15 }
 0x1e5   :  { %v1357_v49 = vpop.permute.xlu0 %1356 }
 0x1e6   :  { %v1220_v63 = vpop.permute.xlu1 %1219  ;;  %1381 = vst.msk [vmem:[%s4608_s10 + $0xe] sm:$0x1] %vm1380_vm8, %v1357_v49 }
 0x1e7   :  { %1243 = vst.msk [vmem:[%s4608_s10 + $0x1d] sm:$0x1] %vm1241_vm2, %v1220_v63 }
 0x1e9   :  { %v588_v1 = vpop.permute.xlu0 %587 }
 0x1ea   :  { %v1359_v17 = vpop.permute.xlu1 %1358  ;;  %v603_v41 = vrot.slane %v588_v1, 1 }
 0x1eb   :  { %1382 = vst.msk [vmem:[%s4608_s10 + $0x1e] sm:$0x1] %vm1380_vm8, %v1359_v17 }
 0x1ec   :  { %v612_v47 = vsel %vm611_vm13, %v588_v1, %v603_v41 }
 0x1ed   :  { %632 = vst.msk [vmem:[%s4608_s10] ss:$8 sm:$0x3] %vm3630_vm14, %v612_v47  ;;  %v745_v61 = vpop.permute.xlu0 %744 }
 0x1ee   :  { %v590_v44 = vpop.permute.xlu1 %589  ;;  %v760_v54 = vrot.slane %v745_v61, 1 }
 0x1ef   :  { %v604_v57 = vrot.slane %v590_v44, 1 }
 0x1f0   :  { %v768_v0 = vsel %vm611_vm13, %v745_v61, %v760_v54 }
 0x1f1   :  { %v613_v27 = vsel %vm611_vm13, %v590_v44, %v604_v57  ;;  %2811 = vst.msk [vmem:[%s4608_s10 + $0x1] ss:$8 sm:$0x3] %vm4231_vm4, %v768_v0  ;;  %v844_v8 = vpop.permute.xlu0 %843 }
 0x1f2   :  { %2804 = vst.msk [vmem:[%s4608_s10 + $0x10] ss:$8 sm:$0x3] %vm3630_vm14, %v613_v27  ;;  %v747_v18 = vpop.permute.xlu1 %746  ;;  %v859_v26 = vrot.slane %v844_v8, 1 }
 0x1f3   :  { %v761_v53 = vrot.slane %v747_v18, 1 }
 0x1f4   :  { %v867_v52 = vsel %vm611_vm13, %v844_v8, %v859_v26 }
 0x1f5   :  { %v769_v30 = vsel %vm611_vm13, %v747_v18, %v761_v53  ;;  %2819 = vst.msk [vmem:[%s4608_s10 + $0x2] ss:$8 sm:$0x3] %vm4256_vm15, %v867_v52  ;;  %v947_v4 = vpop.permute.xlu0 %946 }
 0x1f6   :  { %2812 = vst.msk [vmem:[%s4608_s10 + $0x11] ss:$8 sm:$0x3] %vm4231_vm4, %v769_v30  ;;  %v846_v43 = vpop.permute.xlu1 %845 }
 0x1f7   :  { %v860_v37 = vrot.slane %v846_v43, 1  ;;  %971 = vst.msk [vmem:[%s4608_s10 + $0x23] sm:$0x1] %vm966_vm0, %v947_v4 }
 0x1f8   :  { %972 = vst.msk [vmem:[%s4608_s10 + $0x2b] sm:$0x1] %vm925_vm3, %v947_v4 }
 0x1f9   :  { %v868_v38 = vsel %vm611_vm13, %v846_v43, %v860_v37  ;;  %v1020_v42 = vpop.permute.xlu0 %1019 }
 0x1fa   :  { %2820 = vst.msk [vmem:[%s4608_s10 + $0x12] ss:$8 sm:$0x3] %vm4256_vm15, %v868_v38  ;;  %v949_v62 = vpop.permute.xlu1 %948 }
 0x1fb   :  { %973 = vst.msk [vmem:[%s4608_s10 + $0x33] sm:$0x1] %vm966_vm0, %v949_v62 }
 0x1fc   :  { %974 = vst.msk [vmem:[%s4608_s10 + $0x3b] sm:$0x1] %vm925_vm3, %v949_v62  ;;  %1041 = vst.msk [vmem:[%s4608_s10 + $0x2c] sm:$0x1] %vm925_vm3, %v1020_v42 }
 0x1fd   :  { %v1222_v9 = vpop.permute.xlu0 %1221 }
 0x1fe   :  { %v1022_v23 = vpop.permute.xlu1 %1021  ;;  %1244 = vst.msk [vmem:[%s4608_s10 + $0x2d] sm:$0x1] %vm1241_vm2, %v1222_v9 }
 0x1ff   :  { %1042 = vst.msk [vmem:[%s4608_s10 + $0x3c] sm:$0x1] %vm925_vm3, %v1022_v23 }
 0x201   :  { %v1361_v60 = vpop.permute.xlu0 %1360 }
 0x202   :  { %v1224_v12 = vpop.permute.xlu1 %1223  ;;  %1383 = vst.msk [vmem:[%s4608_s10 + $0x2e] sm:$0x1] %vm1380_vm8, %v1361_v60 }
 0x203   :  { %1245 = vst.msk [vmem:[%s4608_s10 + $0x3d] sm:$0x1] %vm1241_vm2, %v1224_v12 }
 0x205   :  { %v592_v51 = vpop.permute.xlu0 %591 }
 0x206   :  { %v1363_v59 = vpop.permute.xlu1 %1362  ;;  %v605_v3 = vrot.slane %v592_v51, 1 }
 0x207   :  { %1384 = vst.msk [vmem:[%s4608_s10 + $0x3e] sm:$0x1] %vm1380_vm8, %v1363_v59 }
 0x208   :  { %v614_v29 = vsel %vm611_vm13, %v592_v51, %v605_v3 }
 0x209   :  { %2805 = vst.msk [vmem:[%s4608_s10 + $0x20] ss:$8 sm:$0x3] %vm3630_vm14, %v614_v29  ;;  %v749_v19 = vpop.permute.xlu0 %748 }
 0x20a   :  { %v594_v48 = vpop.permute.xlu1 %593  ;;  %v762_v50 = vrot.slane %v749_v19, 1 }
 0x20b   :  { %v606_v16 = vrot.slane %v594_v48, 1 }
 0x20c   :  { %v770_v36 = vsel %vm611_vm13, %v749_v19, %v762_v50 }
 0x20d   :  { %v615_v11 = vsel %vm611_vm13, %v594_v48, %v606_v16  ;;  %2813 = vst.msk [vmem:[%s4608_s10 + $0x21] ss:$8 sm:$0x3] %vm4231_vm4, %v770_v36  ;;  %v848_v58 = vpop.permute.xlu0 %847 }
 0x20e   :  { %2806 = vst.msk [vmem:[%s4608_s10 + $0x30] ss:$8 sm:$0x3] %vm3630_vm14, %v615_v11  ;;  %v751_v2 = vpop.permute.xlu1 %750  ;;  %v861_v7 = vrot.slane %v848_v58, 1 }
 0x20f   :  { %v763_v56 = vrot.slane %v751_v2, 1 }
 0x210   :  { %v869_v31 = vsel %vm611_vm13, %v848_v58, %v861_v7 }
 0x211   :  { %v771_v55 = vsel %vm611_vm13, %v751_v2, %v763_v56  ;;  %2821 = vst.msk [vmem:[%s4608_s10 + $0x22] ss:$8 sm:$0x3] %vm4256_vm15, %v869_v31  ;;  %v951_v46 = vpop.permute.xlu0 %950 }
 0x212   :  { %2814 = vst.msk [vmem:[%s4608_s10 + $0x31] ss:$8 sm:$0x3] %vm4231_vm4, %v771_v55  ;;  %v850_v5 = vpop.permute.xlu1 %849 }
 0x213   :  { %v862_v32 = vrot.slane %v850_v5, 1  ;;  %975 = vst.msk [vmem:[%s4608_s10 + $0x43] sm:$0x1] %vm966_vm0, %v951_v46 }
 0x214   :  { %976 = vst.msk [vmem:[%s4608_s10 + $0x4b] sm:$0x1] %vm925_vm3, %v951_v46 }
 0x215   :  { %v870_v45 = vsel %vm611_vm13, %v850_v5, %v862_v32  ;;  %v1024_v15 = vpop.permute.xlu0 %1023 }
 0x216   :  { %2822 = vst.msk [vmem:[%s4608_s10 + $0x32] ss:$8 sm:$0x3] %vm4256_vm15, %v870_v45  ;;  %v953_v40 = vpop.permute.xlu1 %952 }
 0x217   :  { %977 = vst.msk [vmem:[%s4608_s10 + $0x53] sm:$0x1] %vm966_vm0, %v953_v40 }
 0x218   :  { %978 = vst.msk [vmem:[%s4608_s10 + $0x5b] sm:$0x1] %vm925_vm3, %v953_v40  ;;  %1043 = vst.msk [vmem:[%s4608_s10 + $0x4c] sm:$0x1] %vm925_vm3, %v1024_v15 }
 0x219   :  { %v1226_v63 = vpop.permute.xlu0 %1225 }
 0x21a   :  { %v1026_v34 = vpop.permute.xlu1 %1025  ;;  %1246 = vst.msk [vmem:[%s4608_s10 + $0x4d] sm:$0x1] %vm1241_vm2, %v1226_v63 }
 0x21b   :  { %1044 = vst.msk [vmem:[%s4608_s10 + $0x5c] sm:$0x1] %vm925_vm3, %v1026_v34 }
 0x21d   :  { %v1365_v17 = vpop.permute.xlu0 %1364 }
 0x21e   :  { %v1228_v49 = vpop.permute.xlu1 %1227  ;;  %1385 = vst.msk [vmem:[%s4608_s10 + $0x4e] sm:$0x1] %vm1380_vm8, %v1365_v17 }
 0x21f   :  { %1247 = vst.msk [vmem:[%s4608_s10 + $0x5d] sm:$0x1] %vm1241_vm2, %v1228_v49 }
 0x221   :  { %v596_v41 = vpop.permute.xlu0 %595 }
 0x222   :  { %v1367_v1 = vpop.permute.xlu1 %1366  ;;  %v607_v47 = vrot.slane %v596_v41, 1 }
 0x223   :  { %1386 = vst.msk [vmem:[%s4608_s10 + $0x5e] sm:$0x1] %vm1380_vm8, %v1367_v1 }
 0x224   :  { %v616_v44 = vsel %vm611_vm13, %v596_v41, %v607_v47 }
 0x225   :  { %2807 = vst.msk [vmem:[%s4608_s10 + $0x40] ss:$8 sm:$0x3] %vm3630_vm14, %v616_v44  ;;  %v753_v13 = vpop.permute.xlu0 %752 }
 0x226   :  { %v598_v61 = vpop.permute.xlu1 %597  ;;  %v764_v57 = vrot.slane %v753_v13, 1 }
 0x227   :  { %v608_v35 = vrot.slane %v598_v61, 1 }
 0x228   :  { %v772_v24 = vsel %vm611_vm13, %v753_v13, %v764_v57 }
 0x229   :  { %v617_v54 = vsel %vm611_vm13, %v598_v61, %v608_v35  ;;  %2815 = vst.msk [vmem:[%s4608_s10 + $0x41] ss:$8 sm:$0x3] %vm4231_vm4, %v772_v24  ;;  %v852_v0 = vpop.permute.xlu0 %851  ;;  %v2882_v35 = vld [vmem:[%s4604_s6 + $0x1] ss:$0 sm:$0xff] }
 0x22a   :  { %2808 = vst.msk [vmem:[%s4608_s10 + $0x50] ss:$8 sm:$0x3] %vm3630_vm14, %v617_v54  ;;  %v755_v27 = vpop.permute.xlu1 %754  ;;  %v863_v8 = vrot.slane %v852_v0, 1 }
 0x22b   :  { %v765_v18 = vrot.slane %v755_v27, 1 }
 0x22c   :  { %v871_v53 = vsel %vm611_vm13, %v852_v0, %v863_v8 }
 0x22d   :  { %v773_v33 = vsel %vm611_vm13, %v755_v27, %v765_v18  ;;  %2823 = vst.msk [vmem:[%s4608_s10 + $0x42] ss:$8 sm:$0x3] %vm4256_vm15, %v871_v53  ;;  %v955_v30 = vpop.permute.xlu0 %954 }
 0x22e   :  { %2816 = vst.msk [vmem:[%s4608_s10 + $0x51] ss:$8 sm:$0x3] %vm4231_vm4, %v773_v33  ;;  %v854_v26 = vpop.permute.xlu1 %853 }
 0x22f   :  { %v864_v52 = vrot.slane %v854_v26, 1  ;;  %979 = vst.msk [vmem:[%s4608_s10 + $0x63] sm:$0x1] %vm966_vm0, %v955_v30 }
 0x230   :  { %980 = vst.msk [vmem:[%s4608_s10 + $0x6b] sm:$0x1] %vm925_vm3, %v955_v30 }
 0x231   :  { %v872_v43 = vsel %vm611_vm13, %v854_v26, %v864_v52  ;;  %v1028_v37 = vpop.permute.xlu0 %1027 }
 0x232   :  { %2824 = vst.msk [vmem:[%s4608_s10 + $0x52] ss:$8 sm:$0x3] %vm4256_vm15, %v872_v43  ;;  %v957_v4 = vpop.permute.xlu1 %956 }
 0x233   :  { %981 = vst.msk [vmem:[%s4608_s10 + $0x73] sm:$0x1] %vm966_vm0, %v957_v4 }
 0x234   :  { %982 = vst.msk [vmem:[%s4608_s10 + $0x7b] sm:$0x1] %vm925_vm3, %v957_v4  ;;  %1045 = vst.msk [vmem:[%s4608_s10 + $0x6c] sm:$0x1] %vm925_vm3, %v1028_v37 }
 0x235   :  { %v1230_v62 = vpop.permute.xlu0 %1229 }
 0x236   :  { %v1030_v38 = vpop.permute.xlu1 %1029  ;;  %1248 = vst.msk [vmem:[%s4608_s10 + $0x6d] sm:$0x1] %vm1241_vm2, %v1230_v62 }
 0x237   :  { %1046 = vst.msk [vmem:[%s4608_s10 + $0x7c] sm:$0x1] %vm925_vm3, %v1030_v38 }
 0x239   :  { %v600_v23 = vpop.permute.xlu0 %599 }
 0x23a   :  { %v1232_v42 = vpop.permute.xlu1 %1231  ;;  %v609_v9 = vrot.slane %v600_v23, 1 }
 0x23b   :  { %1249 = vst.msk [vmem:[%s4608_s10 + $0x7d] sm:$0x1] %vm1241_vm2, %v1232_v42 }
 0x23c   :  { %v618_v28 = vsel %vm611_vm13, %v600_v23, %v609_v9 }
 0x23d   :  { %2809 = vst.msk [vmem:[%s4608_s10 + $0x60] ss:$8 sm:$0x3] %vm3630_vm14, %v618_v28  ;;  %v757_v12 = vpop.permute.xlu0 %756 }
 0x23e   :  { %v602_v22 = vpop.permute.xlu1 %601  ;;  %v766_v6 = vrot.slane %v757_v12, 1 }
 0x23f   :  { %v610_v60 = vrot.slane %v602_v22, 1 }
 0x240   :  { %v774_v59 = vsel %vm611_vm13, %v757_v12, %v766_v6 }
 0x241   :  { %v619_v14 = vsel %vm611_vm13, %v602_v22, %v610_v60  ;;  %2817 = vst.msk [vmem:[%s4608_s10 + $0x61] ss:$8 sm:$0x3] %vm4231_vm4, %v774_v59  ;;  %v856_v3 = vpop.permute.xlu0 %855 }
 0x242   :  { %2810 = vst.msk [vmem:[%s4608_s10 + $0x70] ss:$8 sm:$0x3] %vm3630_vm14, %v619_v14  ;;  %v759_v51 = vpop.permute.xlu1 %758  ;;  %v865_v48 = vrot.slane %v856_v3, 1 }
 0x243   :  { %v767_v29 = vrot.slane %v759_v51, 1 }
 0x244   :  { %v873_v16 = vsel %vm611_vm13, %v856_v3, %v865_v48 }
 0x245   :  { %v775_v19 = vsel %vm611_vm13, %v759_v51, %v767_v29  ;;  %2825 = vst.msk [vmem:[%s4608_s10 + $0x62] ss:$8 sm:$0x3] %vm4256_vm15, %v873_v16  ;;  %v1369_v50 = vpop.permute.xlu0 %1368 }
 0x246   :  { %2818 = vst.msk [vmem:[%s4608_s10 + $0x71] ss:$8 sm:$0x3] %vm4231_vm4, %v775_v19  ;;  %v858_v39 = vpop.permute.xlu1 %857  ;;  %v3005_v2 = vpop.f32.mrf.mxu0 }
 0x247   :  { %v866_v11 = vrot.slane %v858_v39, 1  ;;  %1387 = vst.msk [vmem:[%s4608_s10 + $0x6e] sm:$0x1] %vm1380_vm8, %v1369_v50 }
 0x248   :  { %v2138_v58 = vpop.f32.mrf.mxu0 }
 0x249   :  { %v874_v10 = vsel %vm611_vm13, %v858_v39, %v866_v11 }
 0x24a   :  { %2826 = vst.msk [vmem:[%s4608_s10 + $0x72] ss:$8 sm:$0x3] %vm4256_vm15, %v874_v10  ;;  %v1371_v36 = vpop.permute.xlu1 %1370  ;;  %v3008_v56 = vpop.f32.mrf.mxu0 }
 0x24b   :  { %1388 = vst.msk [vmem:[%s4608_s10 + $0x7e] sm:$0x1] %vm1380_vm8, %v1371_v36 }
 0x24c   :  { %v2148_v7 = vpop.f32.mrf.mxu0 }
 0x24e   :  { %v3011_v55 = vpop.f32.mrf.mxu0 }
 0x250   :  { %v2158_v25 = vpop.f32.mrf.mxu0 }
 0x254   :  { %v3014_v1 = vpop.f32.mrf.mxu0 }
 0x256   :  { %v2168_v33 = vpop.f32.mrf.mxu0 }
 0x262   :  { %v2039_v31 = vpop.f32.mrf.mxu1 }
 0x263   :  { %v2178_v5 = vcombine.high %v2039_v31, %v2039_v31  ;;  %v2185_v46 = vrot.slane %v2039_v31, %v3549_v21 }
 0x264   :  { %v2994_v32 = vpop.f32.mrf.mxu1 }
 0x265   :  { %v2192_v45 = vrot.slane %v2178_v5, %v3549_v21  ;;  %v2193_v40 = vcombine.high %v2185_v46, %v2185_v46  ;;  %v2201_v15 = vrot.slane %v2185_v46, %v3549_v21 }
 0x267   :  { %v2194_v34 = vcombine.high %v2192_v45, %v2192_v45  ;;  %v2208_v63 = vrot.slane %v2192_v45, %v3549_v21  ;;  %v2215_v49 = vrot.slane %v2193_v40, %v3549_v21  ;;  %v2223_v17 = vcombine.high %v2201_v15, %v2201_v15 }
 0x268   :  { %v2230_v41 = vrot.slane %v2201_v15, %v3219_v20 }
 0x269   :  { %v2222_v47 = vrot.slane %v2194_v34, %v3549_v21  ;;  %v2224_v44 = vcombine.high %v2208_v63, %v2208_v63  ;;  %v2225_v61 = vcombine.high %v2215_v49, %v2215_v49  ;;  %v2234_v13 = vrot.slane %v2215_v49, %v3219_v20 }
 0x26a   :  { %v2238_v57 = vrot.slane %v2223_v17, %v3219_v20  ;;  %v2246_v54 = vrot.slane %v2208_v63, %v3219_v20  ;;  %v2267_v24 = vadd.f32 %v2230_v41, %v2138_v58 }
 0x26b   :  { %v2226_v27 = vcombine.high %v2222_v47, %v2222_v47  ;;  %v2242_v0 = vrot.slane %v2225_v61, %v3219_v20  ;;  %v2250_v18 = vrot.slane %v2222_v47, %v3219_v20  ;;  %v2254_v8 = vrot.slane %v2224_v44, %v3219_v20 }
 0x26c   :  { %v2268_v53 = vadd.f32 %v3005_v2, %v2234_v13  ;;  %v2269_v26 = vadd.f32 %v2238_v57, %v2148_v7  ;;  %v2271_v30 = vadd.f32 %v2246_v54, %v2158_v25  ;;  %v2283_v52 = vadd.f32 %v2882_v35, %v2267_v24 }
 0x26d   :  { %v2258_v43 = vrot.slane %v2226_v27, %v3219_v20  ;;  %v2270_v4 = vadd.f32 %v3008_v56, %v2242_v0  ;;  %v2272_v37 = vadd.f32 %v3011_v55, %v2250_v18  ;;  %v2273_v38 = vadd.f32 %v2254_v8, %v2168_v33 }
 0x26e   :  { %v2284_v62 = vadd.f32 %v2882_v35, %v2268_v53  ;;  %v2291_v42 = vmax.f32 %v2283_v52, 0.0  ;;  %v2285_v23 = vadd.f32 %v2882_v35, %v2269_v26  ;;  %v2287_v9 = vadd.f32 %v2882_v35, %v2271_v30 }
 0x26f   :  { %v2286_v28 = vadd.f32 %v2882_v35, %v2270_v4  ;;  %v2288_v22 = vadd.f32 %v2882_v35, %v2272_v37  ;;  %v2289_v12 = vadd.f32 %v2882_v35, %v2273_v38  ;;  %v2274_v60 = vadd.f32 %v3014_v1, %v2258_v43 }
 0x270   :  { %v2299_v6 = vsel %vm1486_vm1, %v2291_v42, 0.0  ;;  %3034 = vmatprep.mubr.msk.f32.mxu1 %vm1486_vm1, %v2291_v42  ;;  %v2292_v14 = vmax.f32 %v2284_v62, 0.0  ;;  %v2293_v59 = vmax.f32 %v2285_v23, 0.0  ;;  %v2295_v51 = vmax.f32 %v2287_v9, 0.0 }
 0x271   :  { %v2300_v3 = vrot.slane %v2299_v6, 4  ;;  %v2294_v29 = vmax.f32 %v2286_v28, 0.0  ;;  %v2296_v48 = vmax.f32 %v2288_v22, 0.0  ;;  %v2297_v19 = vmax.f32 %v2289_v12, 0.0 }
 0x272   :  { %v2306_v16 = vsel %vm1486_vm1, %v2292_v14, 0.0  ;;  %3035 = vmatmul.mubr.msk.f32.vlgmr.msra.gmra.mxu1 %vm1486_vm1, %v2292_v14  ;;  %v2313_v39 = vsel %vm1486_vm1, %v2293_v59, 0.0  ;;  %v2327_v50 = vsel %vm1486_vm1, %v2295_v51, 0.0  ;;  %v2290_v11 = vadd.f32 %v2882_v35, %v2274_v60 }
 0x273   :  { %v2301_v10 = vadd.f32 %v2300_v3, %v2299_v6  ;;  %v2307_v36 = vrot.slane %v2306_v16, 4  ;;  %v2314_v2 = vrot.slane %v2313_v39, 4  ;;  %3037 = vmatprep.mubr.msk.f32.mxu1 %vm1486_vm1, %v2293_v59  ;;  %v2320_v58 = vsel %vm1486_vm1, %v2294_v29, 0.0 }
 0x274   :  { %v2321_v56 = vrot.slane %v2320_v58, 4  ;;  %v2328_v7 = vrot.slane %v2327_v50, 4  ;;  %v2334_v55 = vsel %vm1486_vm1, %v2296_v48, 0.0  ;;  %v2341_v31 = vsel %vm1486_vm1, %v2297_v19, 0.0 }
 0x275   :  { %v2302_v5 = vrot.slane %v2301_v10, 2  ;;  %v2308_v46 = vadd.f32 %v2307_v36, %v2306_v16  ;;  %v2315_v25 = vadd.f32 %v2314_v2, %v2313_v39  ;;  %v2335_v32 = vrot.slane %v2334_v55, 4 }
 0x276   :  { %v2322_v45 = vadd.f32 %v2321_v56, %v2320_v58  ;;  %3038 = vmatmul.mubr.msk.f32.gmra.mxu1 %vm1486_vm1, %v2294_v29  ;;  %v2329_v40 = vadd.f32 %v2328_v7, %v2327_v50  ;;  %v2342_v15 = vrot.slane %v2341_v31, 4  ;;  %v2298_v34 = vmax.f32 %v2290_v11, 0.0 }
 0x277   :  { %v2303_v63 = vadd.f32 %v2302_v5, %v2301_v10  ;;  %v2309_v49 = vrot.slane %v2308_v46, 2  ;;  %v2316_v17 = vrot.slane %v2315_v25, 2  ;;  %3040 = vmatprep.mubr.msk.f32.mxu1 %vm1486_vm1, %v2295_v51  ;;  %v2336_v1 = vadd.f32 %v2335_v32, %v2334_v55 }
 0x278   :  { %v2323_v41 = vrot.slane %v2322_v45, 2  ;;  %v2330_v47 = vrot.slane %v2329_v40, 2  ;;  %v2343_v44 = vadd.f32 %v2342_v15, %v2341_v31  ;;  %v2348_v61 = vsel %vm1486_vm1, %v2298_v34, 0.0 }
 0x279   :  { %v2304_v13 = vrot.slane %v2303_v63, 1  ;;  %v2310_v35 = vadd.f32 %v2309_v49, %v2308_v46  ;;  %v2317_v57 = vadd.f32 %v2316_v17, %v2315_v25  ;;  %v2337_v54 = vrot.slane %v2336_v1, 2 }
 0x27a   :  { %v2324_v24 = vadd.f32 %v2323_v41, %v2322_v45  ;;  %v2331_v27 = vadd.f32 %v2330_v47, %v2329_v40  ;;  %3041 = vmatmul.mubr.msk.f32.gmra.mxu1 %vm1486_vm1, %v2296_v48  ;;  %v2344_v0 = vrot.slane %v2343_v44, 2  ;;  %v2349_v18 = vrot.slane %v2348_v61, 4  ;;  %v2901_v41 = vld [vmem:[%s4604_s6 + $0x2] ss:$0 sm:$0xff]  ;;  %s3102_s6 = smov [#allocation2]  }
 0x27b   :  { %v2311_v8 = vrot.slane %v2310_v35, 1  ;;  %v2318_v33 = vrot.slane %v2317_v57, 1  ;;  %v2338_v53 = vadd.f32 %v2337_v54, %v2336_v1  ;;  %3043 = vmatprep.mubr.msk.f32.mxu1 %vm1486_vm1, %v2297_v19  ;;  %v2305_v4 = vadd.f32 %v2304_v13, %v2303_v63  ;;  %s2781_s4 = sshll.u32 %s3102_s6, 4  ;;  %s2782_s4 = int_to_ptr.vmem [resolvable:$true] %s2781_s4 }
 0x27c   :  { %v2325_v26 = vrot.slane %v2324_v24, 1  ;;  %v2332_v30 = vrot.slane %v2331_v27, 1  ;;  %v2345_v52 = vadd.f32 %v2344_v0, %v2343_v44  ;;  %v2350_v43 = vadd.f32 %v2349_v18, %v2348_v61  ;;  %s3074_s17 = scalar_lea.vmem %s2782_s4, 128  ;;  %p3079_p1 = scmp.lt.s32.totalorder %s2782_s4, %s2782_s4 }
 0x27d   :  { %v2312_v37 = vadd.f32 %v2311_v8, %v2310_v35  ;;  %v2319_v38 = vadd.f32 %v2318_v33, %v2317_v57  ;;  %v2339_v62 = vrot.slane %v2338_v53, 1  ;;  %p3075_p0 = scmp.ne.s32.totalorder %s2782_s4, %s3074_s17  ;;  %p3080_p2 = scmp.lt.s32.totalorder %s3074_s17, %s3074_s17 }
 0x27e   :  { %v2326_v42 = vadd.f32 %v2325_v26, %v2324_v24  ;;  %v2346_v23 = vrot.slane %v2345_v52, 1  ;;  %v2351_v9 = vrot.slane %v2350_v43, 2  ;;  %3044 = vmatmul.mubr.msk.f32.gmra.mxu1 %vm1486_vm1, %v2298_v34  ;;  %v2333_v12 = vadd.f32 %v2332_v30, %v2331_v27 }
 0x27f   :  { %v2368_v28 = vsel %vm1555_vm7, %v2312_v37, %v2305_v4  ;;  %v2340_v6 = vadd.f32 %v2339_v62, %v2338_v53  ;;  %p3081_p3 = por %p3080_p2, %p3079_p1 }
 0x280   :  { %v2369_v22 = vsel %vm1557_vm9, %v2319_v38, %v2368_v28  ;;  %v2352_v60 = vadd.f32 %v2351_v9, %v2350_v43  ;;  %v2347_v59 = vadd.f32 %v2346_v23, %v2345_v52 }
 0x281   :  { %v2370_v14 = vsel %vm1559_vm10, %v2326_v42, %v2369_v22  ;;  %p3082_p4 = pnand %p3081_p3, %p3075_p0 }
 0x282   :  { %v2353_v51 = vrot.slane %v2352_v60, 1  ;;  %v2371_v3 = vsel %vm1561_vm11, %v2333_v12, %v2370_v14 }
 0x283   :  { %v2372_v29 = vsel %vm1563_vm5, %v2340_v6, %v2371_v3 }
 0x284   :  { %v2354_v48 = vadd.f32 %v2353_v51, %v2352_v60  ;;  %v2373_v19 = vsel %vm1565_vm6, %v2347_v59, %v2372_v29 }
 0x286   :  { %v2374_v16 = vsel %vm4621_vm12, %v2354_v48, %v2373_v19 }
 0x287   :  { %3024 = vmatmul.mubr.msk.f32.vlgmr.msra.gmra.mxu0 %vm1486_vm1, %v2374_v16 }
 0x332   :  { %v3036_v39 = vpop.f32.mrf.mxu1 }
 0x334   :  { %v2542_v50 = vpop.f32.mrf.mxu1 }
 0x336   :  { %v3039_v11 = vpop.f32.mrf.mxu1 }
 0x338   :  { %v2552_v10 = vpop.f32.mrf.mxu1 }
 0x33a   :  { %v3042_v36 = vpop.f32.mrf.mxu1 }
 0x33c   :  { %v2562_v7 = vpop.f32.mrf.mxu1 }
 0x33e   :  { %v3045_v15 = vpop.f32.mrf.mxu1 }
 0x340   :  { %v2572_v54 = vpop.f32.mrf.mxu1 }
 0x347   :  { %v2443_v2 = vpop.f32.mrf.mxu0 }
 0x348   :  { %v2582_v58 = vcombine.high %v2443_v2, %v2443_v2  ;;  %v2589_v56 = vrot.slane %v2443_v2, %v3549_v21 }
 0x349   :  { %v3025_v55 = vpop.f32.mrf.mxu0 }
 0x34a   :  { %v2596_v31 = vrot.slane %v2582_v58, %v3549_v21  ;;  %v2597_v5 = vcombine.high %v2589_v56, %v2589_v56  ;;  %v2605_v46 = vrot.slane %v2589_v56, %v3549_v21 }
 0x34c   :  { %v2598_v25 = vcombine.high %v2596_v31, %v2596_v31  ;;  %v2612_v32 = vrot.slane %v2596_v31, %v3549_v21  ;;  %v2619_v45 = vrot.slane %v2597_v5, %v3549_v21  ;;  %v2627_v40 = vcombine.high %v2605_v46, %v2605_v46 }
 0x34d   :  { %v2634_v34 = vrot.slane %v2605_v46, %v3219_v20 }
 0x34e   :  { %v2626_v63 = vrot.slane %v2598_v25, %v3549_v21  ;;  %v2628_v49 = vcombine.high %v2612_v32, %v2612_v32  ;;  %v2629_v17 = vcombine.high %v2619_v45, %v2619_v45  ;;  %v2638_v1 = vrot.slane %v2619_v45, %v3219_v20 }
 0x34f   :  { %v2642_v47 = vrot.slane %v2627_v40, %v3219_v20  ;;  %v2650_v44 = vrot.slane %v2612_v32, %v3219_v20  ;;  %v2671_v61 = vadd.f32 %v2634_v34, %v2542_v50 }
 0x350   :  { %v2630_v13 = vcombine.high %v2626_v63, %v2626_v63  ;;  %v2646_v35 = vrot.slane %v2629_v17, %v3219_v20  ;;  %v2654_v57 = vrot.slane %v2626_v63, %v3219_v20  ;;  %v2658_v21 = vrot.slane %v2628_v49, %v3219_v20 }
 0x351   :  { %v2672_v24 = vadd.f32 %v3036_v39, %v2638_v1  ;;  %v2673_v27 = vadd.f32 %v2642_v47, %v2552_v10  ;;  %v2675_v0 = vadd.f32 %v2650_v44, %v2562_v7  ;;  %v2687_v18 = vadd.f32 %v2901_v41, %v2671_v61 }
 0x352   :  { %v2662_v8 = vrot.slane %v2630_v13, %v3219_v20  ;;  %v2674_v33 = vadd.f32 %v3039_v11, %v2646_v35  ;;  %v2676_v53 = vadd.f32 %v3042_v36, %v2654_v57  ;;  %v2677_v26 = vadd.f32 %v2658_v21, %v2572_v54 }
 0x353   :  { %v2688_v30 = vadd.f32 %v2901_v41, %v2672_v24  ;;  %v2689_v52 = vadd.f32 %v2901_v41, %v2673_v27  ;;  %v2691_v43 = vadd.f32 %v2901_v41, %v2675_v0  ;;  %v2695_v4 = vmax.f32 %v2687_v18, 0.0 }
 0x354   :  { %v2678_v37 = vadd.f32 %v3045_v15, %v2662_v8  ;;  %v2690_v38 = vadd.f32 %v2901_v41, %v2674_v33  ;;  %v2692_v62 = vadd.f32 %v2901_v41, %v2676_v53  ;;  %v2693_v42 = vadd.f32 %v2901_v41, %v2677_v26 }
 0x355   :  { %v2696_v23 = vmax.f32 %v2688_v30, 0.0  ;;  %v2697_v9 = vmax.f32 %v2689_v52, 0.0  ;;  %v2699_v28 = vmax.f32 %v2691_v43, 0.0  ;;  %v2703_v22 = vsel %vm1486_vm1, %v2695_v4, 0.0 }
 0x356   :  { %v2694_v12 = vadd.f32 %v2901_v41, %v2678_v37  ;;  %v2698_v60 = vmax.f32 %v2690_v38, 0.0  ;;  %v2700_v6 = vmax.f32 %v2692_v62, 0.0  ;;  %v2701_v20 = vmax.f32 %v2693_v42, 0.0 }
 0x357   :  { %v2704_v14 = vrot.slane %v2703_v22, 4  ;;  %v2710_v59 = vsel %vm1486_vm1, %v2696_v23, 0.0  ;;  %v2717_v51 = vsel %vm1486_vm1, %v2697_v9, 0.0  ;;  %v2731_v3 = vsel %vm1486_vm1, %v2699_v28, 0.0 }
 0x358   :  { %v2702_v29 = vmax.f32 %v2694_v12, 0.0  ;;  %v2711_v48 = vrot.slane %v2710_v59, 4  ;;  %v2718_v19 = vrot.slane %v2717_v51, 4  ;;  %v2724_v16 = vsel %vm1486_vm1, %v2698_v60, 0.0 }
 0x359   :  { %v2705_v39 = vadd.f32 %v2704_v14, %v2703_v22  ;;  %v2725_v50 = vrot.slane %v2724_v16, 4  ;;  %v2732_v11 = vrot.slane %v2731_v3, 4  ;;  %v2738_v10 = vsel %vm1486_vm1, %v2700_v6, 0.0 }
 0x35a   :  { %v2712_v36 = vadd.f32 %v2711_v48, %v2710_v59  ;;  %v2719_v2 = vadd.f32 %v2718_v19, %v2717_v51  ;;  %v2739_v58 = vrot.slane %v2738_v10, 4  ;;  %v2745_v56 = vsel %vm1486_vm1, %v2701_v20, 0.0 }
 0x35b   :  { %v2706_v7 = vrot.slane %v2705_v39, 2  ;;  %v2726_v55 = vadd.f32 %v2725_v50, %v2724_v16  ;;  %v2733_v31 = vadd.f32 %v2732_v11, %v2731_v3  ;;  %v2746_v5 = vrot.slane %v2745_v56, 4 }
 0x35c   :  { %v2713_v46 = vrot.slane %v2712_v36, 2  ;;  %v2720_v25 = vrot.slane %v2719_v2, 2  ;;  %v2740_v32 = vadd.f32 %v2739_v58, %v2738_v10  ;;  %v2752_v45 = vsel %vm1486_vm1, %v2702_v29, 0.0 }
 0x35d   :  { %v2707_v40 = vadd.f32 %v2706_v7, %v2705_v39  ;;  %v2727_v15 = vrot.slane %v2726_v55, 2  ;;  %v2734_v34 = vrot.slane %v2733_v31, 2  ;;  %v2747_v63 = vadd.f32 %v2746_v5, %v2745_v56 }
 0x35e   :  { %v2714_v49 = vadd.f32 %v2713_v46, %v2712_v36  ;;  %v2721_v17 = vadd.f32 %v2720_v25, %v2719_v2  ;;  %v2741_v1 = vrot.slane %v2740_v32, 2  ;;  %v2753_v41 = vrot.slane %v2752_v45, 4 }
 0x35f   :  { %v2708_v47 = vrot.slane %v2707_v40, 1  ;;  %v2728_v44 = vadd.f32 %v2727_v15, %v2726_v55  ;;  %v2735_v61 = vadd.f32 %v2734_v34, %v2733_v31  ;;  %v2748_v13 = vrot.slane %v2747_v63, 2 }
 0x360   :  { %v2715_v35 = vrot.slane %v2714_v49, 1  ;;  %v2722_v57 = vrot.slane %v2721_v17, 1  ;;  %v2742_v21 = vadd.f32 %v2741_v1, %v2740_v32  ;;  %v2754_v54 = vadd.f32 %v2753_v41, %v2752_v45 }
 0x361   :  { %v2709_v24 = vadd.f32 %v2708_v47, %v2707_v40  ;;  %v2729_v27 = vrot.slane %v2728_v44, 1  ;;  %v2736_v0 = vrot.slane %v2735_v61, 1  ;;  %v2749_v18 = vadd.f32 %v2748_v13, %v2747_v63 }
 0x362   :  { %v2716_v8 = vadd.f32 %v2715_v35, %v2714_v49  ;;  %v2723_v33 = vadd.f32 %v2722_v57, %v2721_v17  ;;  %v2743_v53 = vrot.slane %v2742_v21, 1  ;;  %v2755_v26 = vrot.slane %v2754_v54, 2 }
 0x363   :  { %v2730_v30 = vadd.f32 %v2729_v27, %v2728_v44  ;;  %v2737_v52 = vadd.f32 %v2736_v0, %v2735_v61  ;;  %v2750_v43 = vrot.slane %v2749_v18, 1  ;;  %v2760_v4 = vmul.f32 0.125, %v2709_v24 }
 0x364   :  { %v2744_v37 = vadd.f32 %v2743_v53, %v2742_v21  ;;  %v2756_v38 = vadd.f32 %v2755_v26, %v2754_v54  ;;  %v2761_v62 = vmul.f32 0.125, %v2716_v8  ;;  %v2762_v42 = vmul.f32 0.125, %v2723_v33 }
 0x365   :  { %v2751_v23 = vadd.f32 %v2750_v43, %v2749_v18  ;;  %v2763_v9 = vmul.f32 0.125, %v2730_v30  ;;  %v2764_v28 = vmul.f32 0.125, %v2737_v52  ;;  %vm4622_vm1 = vcmask 253952  }
 0x366   :  { %2768 = vst.msk [vmem:[#allocation2] sm:$0x1] %vm4622_vm1, %v2760_v4  ;;  %v2757_v22 = vrot.slane %v2756_v38, 1  ;;  %v2765_v12 = vmul.f32 0.125, %v2744_v37  ;;  %vm4623_vm7 = vmmov %vm4622_vm1 }
 0x367   :  { %2769 = vst.msk [vmem:[#allocation2 + $0x1] sm:$0x1] %vm4623_vm7, %v2761_v62  ;;  %vm4624_vm9 = vmmov %vm4622_vm1  ;;  %v2766_v60 = vmul.f32 0.125, %v2751_v23 }
 0x368   :  { %2770 = vst.msk [vmem:[#allocation2 + $0x2] sm:$0x1] %vm4624_vm9, %v2762_v42  ;;  %vm4625_vm10 = vmmov %vm4622_vm1  ;;  %v2758_v6 = vadd.f32 %v2757_v22, %v2756_v38 }
 0x369   :  { %2771 = vst.msk [vmem:[#allocation2 + $0x3] sm:$0x1] %vm4625_vm10, %v2763_v9  ;;  %vm4626_vm11 = vmmov %vm4622_vm1 }
 0x36a   :  { %2772 = vst.msk [vmem:[#allocation2 + $0x4] sm:$0x1] %vm4626_vm11, %v2764_v28  ;;  %vm4627_vm5 = vmmov %vm4622_vm1  ;;  %v2767_v20 = vmul.f32 0.125, %v2758_v6 }
 0x36b   :  { %2773 = vst.msk [vmem:[#allocation2 + $0x5] sm:$0x1] %vm4627_vm5, %v2765_v12  ;;  %vm4628_vm6 = vmmov %vm4622_vm1 }
 0x36c   :  { %2774 = vst.msk [vmem:[#allocation2 + $0x6] sm:$0x1] %vm4628_vm6, %v2766_v60  ;;  %vm4629_vm3 = vmmov %vm4622_vm1 }
 0x36d   :  { %2775 = vst.msk [vmem:[#allocation2 + $0x7] sm:$0x1] %vm4629_vm3, %v2767_v20 }
 0x36e   :  { %3085 = shalt.err (!%p3082_p4)
}
 0x36f   :  { %s3103_s0 = smov 16   ;;  %s3104_s8 = smov 1  }
 0x370   :  { %2787 = dma.vmem_to_hbm [thread:$0]  %s2782_s4, 128, %s4607_s9, [#allocation3], %s3103_s0, %s3103_s0, %s3104_s8  }
 0x371   :  { %3094 = dma.done.wait [#allocation3], 128  }
 0x372   :  { %3095 = vsyncadd [#allocation3], 4294967168 }
 0x373   :  { %2795 = vsyncpa [#allocation3], 1 }

</bundles_post_ra>
